<compile_context>
chip_gen: v7x
topology: tpu7x:2x2x1
jax: 0.10.0
libtpu: 0.0.40
codegen_flags: <defaults>
</compile_context>

<pallas_src>
import jax
import jax.numpy as jnp
from jax.experimental import pallas as pl
from jax.experimental.pallas import tpu as pltpu

jax.config.update("jax_default_matmul_precision", "highest")

B, N, D, V = 2, 8, 32, 64          # batch, seq, model dim, vocab
H, HD, F = 4, 8, 64                # heads, head dim (H*HD == D), ffn hidden
VP = 128                           # lane-dense (padded) vocab for the LM-head store
EPS = 1e-5

# Grid over blocks of whole sequences. At rollout scale this packs >=128 tokens per
# grid step; at the tiny test size it is a single step.
SEQ_PER_BLOCK = min(B, max(1, 128 // N))
assert B % SEQ_PER_BLOCK == 0
GRID = B // SEQ_PER_BLOCK
BNK = SEQ_PER_BLOCK * N            # tokens per grid step
G = H * BNK                        # head-on-lane key rows per grid step


def _build_attn_constants():
    # head selection: key row g = h*BNK + m only "lives" in head h's HD lanes
    g_head = jnp.arange(G, dtype=jnp.int32)[:, None] // BNK            # (G, 1)
    d_head = jnp.arange(D, dtype=jnp.int32)[None, :] // HD             # (1, D)
    head_sel = (g_head == d_head).astype(jnp.float32)                  # (G, D)
    # additive causal + same-sequence mask: 0 where valid, -1e30 where masked
    r = jnp.arange(BNK, dtype=jnp.int32)[:, None]
    m = jnp.arange(G, dtype=jnp.int32)[None, :] % BNK
    valid = (m // N == r // N) & (m <= r)
    bias = jnp.where(valid, 0.0, -1e30).astype(jnp.float32)            # (BNK, G)
    return head_sel, bias


HEAD_SEL, ATTN_BIAS = _build_attn_constants()


def _layernorm(x, g, b):
    mu = jnp.mean(x, axis=-1, keepdims=True)
    var = jnp.mean((x - mu) ** 2, axis=-1, keepdims=True)
    return (x - mu) * jax.lax.rsqrt(var + EPS) * g + b


def actor_kernel(tok_ref, emb_ref, ln_ref, wqkv_ref, wo_ref, w1_ref, w2_ref,
                 wlm_ref, hsel_ref, bias_ref, out_ref):
    f32 = jnp.float32

    # ---- fused embedding lookup: one-hot (BNK, V) @ (V, D) on the MXU ----
    tok = tok_ref[...]                                                  # (BNK, 1) int32
    one_hot = (jax.lax.broadcasted_iota(jnp.int32, (BNK, V), 1) == tok).astype(f32)
    x = jnp.dot(one_hot, emb_ref[...], preferred_element_type=f32)      # (BNK, D)

    # ---- packed LayerNorm slab: one (8, D) input instead of six (1, D) inputs ----
    ln = ln_ref[...]
    ln1_g, ln1_b = ln[0:1, :], ln[1:2, :]
    ln2_g, ln2_b = ln[2:3, :], ln[3:4, :]
    lnf_g, lnf_b = ln[4:5, :], ln[5:6, :]

    # ---- attention sub-block (pre-LN, causal MHA, residual) ----
    h = _layernorm(x, ln1_g, ln1_b)
    qkv = jnp.dot(h, wqkv_ref[...], preferred_element_type=f32)         # ONE (BNK,D)x(D,3D)
    q = qkv[:, :D] * (1.0 / HD ** 0.5)
    k = qkv[:, D:2 * D]
    v = qkv[:, 2 * D:]

    hsel = hsel_ref[...]                                                # (G, D) constant
    k_blk = jnp.tile(k, (H, 1)) * hsel                                  # (G, D)
    # fused RHS: [ per-head-masked V | head_sel ] -> one matmul gives num and denom
    vh = jnp.concatenate([jnp.tile(v, (H, 1)) * hsel, hsel], axis=-1)   # (G, 2D)

    # all heads x all rows of causal scores in one (BNK, D) x (G, D)^T matmul
    s = jax.lax.dot_general(q, k_blk, (((1,), (1,)), ((), ())),
                            preferred_element_type=f32)                 # (BNK, G)
    s = s + bias_ref[...]                                               # constant mask, one vadd

    # numerically safe per-head max subtraction (max of each head's BNK-wide segment)
    segs = []
    for hi in range(H):
        seg = s[:, hi * BNK:(hi + 1) * BNK]
        segs.append(seg - jnp.max(seg, axis=-1, keepdims=True))
    p = jnp.exp(jnp.concatenate(segs, axis=-1))                         # (BNK, G)

    o2 = jnp.dot(p, vh, preferred_element_type=f32)                     # (BNK, 2D): [num | denom]
    attn = o2[:, :D] / o2[:, D:]                                        # exact softmax normalization
    x = x + jnp.dot(attn, wo_ref[...], preferred_element_type=f32)

    # ---- FFN sub-block (pre-LN, tanh-GELU, residual) ----
    h = _layernorm(x, ln2_g, ln2_b)
    u = jnp.dot(h, w1_ref[...], preferred_element_type=f32)             # (BNK, F)
    u = 0.5 * u * (1.0 + jnp.tanh(0.7978845608028654 * (u + 0.044715 * u * u * u)))
    x = x + jnp.dot(u, w2_ref[...], preferred_element_type=f32)

    # ---- final norm + lane-dense LM head (pre-padded to 128 lanes) ----
    h = _layernorm(x, lnf_g, lnf_b)
    out_ref[...] = jnp.dot(h, wlm_ref[...], preferred_element_type=f32)  # (BNK, VP)


def _actor_forward_impl(x_tokens, p):
    tok = x_tokens.reshape(B * N, 1).astype(jnp.int32)

    def full(shape):
        return pl.BlockSpec(shape, lambda i: (0, 0))        # weight/constant: VMEM resident

    out = pl.pallas_call(
        actor_kernel,
        out_shape=jax.ShapeDtypeStruct((B * N, VP), jnp.float32),
        grid=(GRID,),
        in_specs=[
            pl.BlockSpec((BNK, 1), lambda i: (i, 0)),        # tokens: per-block rows
            full((V, D)),                                    # emb
            full((8, D)),                                    # packed LayerNorm slab
            full((D, 3 * D)),                                # fused wqkv
            full((D, D)),                                    # wo
            full((D, F)),                                    # w1
            full((F, D)),                                    # w2
            full((D, VP)),                                   # wlm (padded once at init)
            full((G, D)),                                    # head_sel constant
            full((BNK, G)),                                  # additive causal-mask constant
        ],
        out_specs=pl.BlockSpec((BNK, VP), lambda i: (i, 0)),
        compiler_params=pltpu.CompilerParams(dimension_semantics=("parallel",)),
    )(tok, p["emb"], p["ln_slab"], p["wqkv"], p["wo"], p["w1"], p["w2"],
      p["wlm_pad"], HEAD_SEL, ATTN_BIAS)

    return out[:, :V].reshape(B, N, V)


actor_forward = jax.jit(_actor_forward_impl)


def critic_forward(p):
    # TODO(synk): critic() takes no arguments in the reference forward; values are a parameter read.
    return p["critic_values"]                                # (B, N)


def actor_critic_forward(x_tokens, params, mask=None, return_values=True):
    del mask  # reference forward passes x straight to actor_palm; mask is unused there
    action_logits = actor_forward(x_tokens, params)          # (B, N, V)
    if not return_values:
        return action_logits, None
    return action_logits, critic_forward(params)             # (B, N)


def init_params(key):
    ks = jax.random.split(key, 6)
    s = 0.02
    ln_slab = jnp.zeros((8, D), jnp.float32)
    # rows: ln1_g, ln1_b, ln2_g, ln2_b, lnf_g, lnf_b, pad, pad
    ln_slab = ln_slab.at[0].set(1.0).at[2].set(1.0).at[4].set(1.0)
    wlm = jax.random.normal(ks[5], (D, V), jnp.float32) * s
    return {
        "emb": jax.random.normal(ks[0], (V, D), jnp.float32) * s,
        "ln_slab": ln_slab,
        "wqkv": jax.random.normal(ks[1], (D, 3 * D), jnp.float32) * s,
        "wo": jax.random.normal(ks[2], (D, D), jnp.float32) * s,
        "w1": jax.random.normal(ks[3], (D, F), jnp.float32) * s,
        "w2": jax.random.normal(ks[4], (F, D), jnp.float32) * s,
        "wlm_pad": jnp.pad(wlm, ((0, 0), (0, VP - V))),      # lane-dense LM head, padded ONCE here
        "critic_values": jnp.zeros((B, N), jnp.float32),
    }


def _actor_reference(x_tokens, p):
    # pure-JAX reference (standard per-head attention) for the correctness spot check
    ln_rows = p["ln_slab"]
    wlm = p["wlm_pad"][:, :V]

    def ln(t, g, b):
        mu = t.mean(-1, keepdims=True)
        var = ((t - mu) ** 2).mean(-1, keepdims=True)
        return (t - mu) * jax.lax.rsqrt(var + EPS) * g + b

    def one(x):
        h = ln(x, ln_rows[0], ln_rows[1])
        qkv = h @ p["wqkv"]
        q, k, v = qkv[:, :D], qkv[:, D:2 * D], qkv[:, 2 * D:]
        causal = jnp.tril(jnp.ones((N, N), bool))
        outs = []
        for hi in range(H):
            qs, ks_, vs = (t[:, hi * HD:(hi + 1) * HD] for t in (q, k, v))
            sc = (qs @ ks_.T) / (HD ** 0.5)
            sc = jnp.where(causal, sc, -1e30)
            pm = jax.nn.softmax(sc, axis=-1)
            outs.append(pm @ vs)
        x = x + jnp.concatenate(outs, -1) @ p["wo"]
        h = ln(x, ln_rows[2], ln_rows[3])
        u = h @ p["w1"]
        u = 0.5 * u * (1.0 + jnp.tanh(0.7978845608028654 * (u + 0.044715 * u ** 3)))
        x = x + u @ p["w2"]
        return ln(x, ln_rows[4], ln_rows[5]) @ wlm

    return jax.vmap(one)(p["emb"][x_tokens])


if __name__ == "__main__":
    key = jax.random.PRNGKey(0)
    pkey, xkey = jax.random.split(key)
    params = init_params(pkey)
    x = jax.random.randint(xkey, (B, N), 0, V, dtype=jnp.int32)

    logits, values = actor_critic_forward(x, params, return_values=True)
    logits = jax.block_until_ready(logits)
    values = jax.block_until_ready(values)

    ref = jax.block_until_ready(_actor_reference(x, params))
    assert logits.shape == (B, N, V) and values.shape == (B, N)
    max_err = float(jnp.max(jnp.abs(logits - ref)))
    # exact division + per-head max -> tight tolerance (previous approx-reciprocal version
    # needed 2e-3)
    assert jnp.allclose(logits, ref, atol=1e-4, rtol=1e-4), max_err
    print("KERNEL_OK")
</pallas_src>

<mosaic_0001>
module attributes {stable_mosaic.version = 11 : i64} {
  func.func @actor_kernel(%arg0: i32, %arg1: memref<16x1xi32, #tpu.memory_space<vmem>>, %arg2: memref<64x32xf32, #tpu.memory_space<vmem>>, %arg3: memref<8x32xf32, #tpu.memory_space<vmem>>, %arg4: memref<32x96xf32, #tpu.memory_space<vmem>>, %arg5: memref<32x32xf32, #tpu.memory_space<vmem>>, %arg6: memref<32x64xf32, #tpu.memory_space<vmem>>, %arg7: memref<64x32xf32, #tpu.memory_space<vmem>>, %arg8: memref<32x128xf32, #tpu.memory_space<vmem>>, %arg9: memref<64x32xf32, #tpu.memory_space<vmem>>, %arg10: memref<16x64xf32, #tpu.memory_space<vmem>>, %arg11: memref<16x128xf32, #tpu.memory_space<vmem>>) attributes {dimension_semantics = [#tpu.dimension_semantics<parallel>], iteration_bounds = array<i64: 1>, scalar_prefetch = 0 : i64, scratch_operands = 0 : i64, tpu.core_type = #tpu.core_type<tc>, window_params = [{transform_indices = @transform_0, window_bounds = array<i64: 16, 1>}, {pipeline_mode = #tpu.pipeline_mode<synchronous>, transform_indices = @transform_1, window_bounds = array<i64: 64, 32>}, {pipeline_mode = #tpu.pipeline_mode<synchronous>, transform_indices = @transform_2, window_bounds = array<i64: 8, 32>}, {pipeline_mode = #tpu.pipeline_mode<synchronous>, transform_indices = @transform_3, window_bounds = array<i64: 32, 96>}, {pipeline_mode = #tpu.pipeline_mode<synchronous>, transform_indices = @transform_4, window_bounds = array<i64: 32, 32>}, {pipeline_mode = #tpu.pipeline_mode<synchronous>, transform_indices = @transform_5, window_bounds = array<i64: 32, 64>}, {pipeline_mode = #tpu.pipeline_mode<synchronous>, transform_indices = @transform_6, window_bounds = array<i64: 64, 32>}, {pipeline_mode = #tpu.pipeline_mode<synchronous>, transform_indices = @transform_7, window_bounds = array<i64: 32, 128>}, {pipeline_mode = #tpu.pipeline_mode<synchronous>, transform_indices = @transform_8, window_bounds = array<i64: 64, 32>}, {pipeline_mode = #tpu.pipeline_mode<synchronous>, transform_indices = @transform_9, window_bounds = array<i64: 16, 64>}, {transform_indices = @transform_10, window_bounds = array<i64: 16, 128>}]} {
    %c0 = arith.constant 0 : index
    %c0_0 = arith.constant 0 : index
    %0 = vector.load %arg1[%c0, %c0_0] : memref<16x1xi32, #tpu.memory_space<vmem>>, vector<16x1xi32>
    %1 = tpu.iota {dimensions = array<i32: 1>} : vector<16x64xi32>
    %2 = vector.broadcast %0 : vector<16x1xi32> to vector<16x64xi32>
    %3 = arith.cmpi eq, %1, %2 : vector<16x64xi32>
    %4 = arith.extui %3 : vector<16x64xi1> to vector<16x64xi32>
    %5 = arith.sitofp %4 : vector<16x64xi32> to vector<16x64xf32>
    %c0_1 = arith.constant 0 : index
    %c0_2 = arith.constant 0 : index
    %6 = vector.load %arg2[%c0_1, %c0_2] : memref<64x32xf32, #tpu.memory_space<vmem>>, vector<64x32xf32>
    %cst = arith.constant dense<0.000000e+00> : vector<16x32xf32>
    %7 = tpu.matmul %5, %6, %cst {dimension_numbers = #tpu.dot_dimension_numbers<[1], [0], [0], [1], [0, 0, 1, 1], [], []>, precision = #tpu.contract_precision<fp32>} : vector<16x64xf32>, vector<64x32xf32>, vector<16x32xf32> -> vector<16x32xf32>
    %c0_3 = arith.constant 0 : index
    %c0_4 = arith.constant 0 : index
    %8 = vector.load %arg3[%c0_3, %c0_4] : memref<8x32xf32, #tpu.memory_space<vmem>>, vector<8x32xf32>
    %9 = vector.extract_strided_slice %8 {offsets = [0, 0], sizes = [1, 32], strides = [1, 1]} : vector<8x32xf32> to vector<1x32xf32>
    %10 = vector.extract_strided_slice %8 {offsets = [1, 0], sizes = [1, 32], strides = [1, 1]} : vector<8x32xf32> to vector<1x32xf32>
    %11 = vector.extract_strided_slice %8 {offsets = [2, 0], sizes = [1, 32], strides = [1, 1]} : vector<8x32xf32> to vector<1x32xf32>
    %12 = vector.extract_strided_slice %8 {offsets = [3, 0], sizes = [1, 32], strides = [1, 1]} : vector<8x32xf32> to vector<1x32xf32>
    %13 = vector.extract_strided_slice %8 {offsets = [4, 0], sizes = [1, 32], strides = [1, 1]} : vector<8x32xf32> to vector<1x32xf32>
    %14 = vector.extract_strided_slice %8 {offsets = [5, 0], sizes = [1, 32], strides = [1, 1]} : vector<8x32xf32> to vector<1x32xf32>
    %cst_5 = arith.constant dense<0.000000e+00> : vector<16xf32>
    %15 = vector.multi_reduction <add>, %7, %cst_5 [1] : vector<16x32xf32> to vector<16xf32>
    %16 = vector.shape_cast %15 : vector<16xf32> to vector<16x1xf32>
    %cst_6 = arith.constant 3.200000e+01 : f32
    %17 = vector.broadcast %cst_6 : f32 to vector<16x1xf32>
    %18 = arith.divf %16, %17 : vector<16x1xf32>
    %19 = vector.broadcast %18 : vector<16x1xf32> to vector<16x32xf32>
    %20 = arith.subf %7, %19 : vector<16x32xf32>
    %21 = arith.mulf %20, %20 : vector<16x32xf32>
    %cst_7 = arith.constant dense<0.000000e+00> : vector<16xf32>
    %22 = vector.multi_reduction <add>, %21, %cst_7 [1] : vector<16x32xf32> to vector<16xf32>
    %23 = vector.shape_cast %22 : vector<16xf32> to vector<16x1xf32>
    %cst_8 = arith.constant 3.200000e+01 : f32
    %24 = vector.broadcast %cst_8 : f32 to vector<16x1xf32>
    %25 = arith.divf %23, %24 : vector<16x1xf32>
    %26 = vector.broadcast %18 : vector<16x1xf32> to vector<16x32xf32>
    %27 = arith.subf %7, %26 : vector<16x32xf32>
    %cst_9 = arith.constant 9.99999974E-6 : f32
    %28 = vector.broadcast %cst_9 : f32 to vector<16x1xf32>
    %29 = arith.addf %25, %28 : vector<16x1xf32>
    %30 = math.rsqrt %29 : vector<16x1xf32>
    %31 = vector.broadcast %30 : vector<16x1xf32> to vector<16x32xf32>
    %32 = arith.mulf %27, %31 : vector<16x32xf32>
    %33 = vector.broadcast %9 : vector<1x32xf32> to vector<16x32xf32>
    %34 = arith.mulf %32, %33 : vector<16x32xf32>
    %35 = vector.broadcast %10 : vector<1x32xf32> to vector<16x32xf32>
    %36 = arith.addf %34, %35 : vector<16x32xf32>
    %c0_10 = arith.constant 0 : index
    %c0_11 = arith.constant 0 : index
    %37 = vector.load %arg4[%c0_10, %c0_11] : memref<32x96xf32, #tpu.memory_space<vmem>>, vector<32x96xf32>
    %cst_12 = arith.constant dense<0.000000e+00> : vector<16x96xf32>
    %38 = tpu.matmul %36, %37, %cst_12 {dimension_numbers = #tpu.dot_dimension_numbers<[1], [0], [0], [1], [0, 0, 1, 1], [], []>, precision = #tpu.contract_precision<fp32>} : vector<16x32xf32>, vector<32x96xf32>, vector<16x96xf32> -> vector<16x96xf32>
    %39 = vector.extract_strided_slice %38 {offsets = [0, 0], sizes = [16, 32], strides = [1, 1]} : vector<16x96xf32> to vector<16x32xf32>
    %cst_13 = arith.constant 0.353553385 : f32
    %40 = vector.broadcast %cst_13 : f32 to vector<16x32xf32>
    %41 = arith.mulf %39, %40 : vector<16x32xf32>
    %42 = vector.extract_strided_slice %38 {offsets = [0, 32], sizes = [16, 32], strides = [1, 1]} : vector<16x96xf32> to vector<16x32xf32>
    %43 = vector.extract_strided_slice %38 {offsets = [0, 64], sizes = [16, 32], strides = [1, 1]} : vector<16x96xf32> to vector<16x32xf32>
    %c0_14 = arith.constant 0 : index
    %c0_15 = arith.constant 0 : index
    %44 = vector.load %arg9[%c0_14, %c0_15] : memref<64x32xf32, #tpu.memory_space<vmem>>, vector<64x32xf32>
    %45 = tpu.concatenate %42, %42, %42, %42 in 0 : vector<16x32xf32>, vector<16x32xf32>, vector<16x32xf32>, vector<16x32xf32> -> vector<64x32xf32>
    %46 = arith.mulf %45, %44 : vector<64x32xf32>
    %47 = tpu.concatenate %43, %43, %43, %43 in 0 : vector<16x32xf32>, vector<16x32xf32>, vector<16x32xf32>, vector<16x32xf32> -> vector<64x32xf32>
    %48 = arith.mulf %47, %44 : vector<64x32xf32>
    %49 = tpu.concatenate %48, %44 in 1 : vector<64x32xf32>, vector<64x32xf32> -> vector<64x64xf32>
    %cst_16 = arith.constant dense<0.000000e+00> : vector<16x64xf32>
    %50 = tpu.matmul %41, %46, %cst_16 {dimension_numbers = #tpu.dot_dimension_numbers<[1], [1], [0], [0], [0, 0, 1, 0], [], []>, precision = #tpu.contract_precision<fp32>} : vector<16x32xf32>, vector<64x32xf32>, vector<16x64xf32> -> vector<16x64xf32>
    %c0_17 = arith.constant 0 : index
    %c0_18 = arith.constant 0 : index
    %51 = vector.load %arg10[%c0_17, %c0_18] : memref<16x64xf32, #tpu.memory_space<vmem>>, vector<16x64xf32>
    %52 = arith.addf %50, %51 : vector<16x64xf32>
    %53 = vector.extract_strided_slice %52 {offsets = [0, 0], sizes = [16, 16], strides = [1, 1]} : vector<16x64xf32> to vector<16x16xf32>
    %cst_19 = arith.constant dense<0xFF800000> : vector<16xf32>
    %54 = vector.multi_reduction <maximumf>, %53, %cst_19 [1] : vector<16x16xf32> to vector<16xf32>
    %55 = vector.shape_cast %54 : vector<16xf32> to vector<16x1xf32>
    %56 = vector.broadcast %55 : vector<16x1xf32> to vector<16x16xf32>
    %57 = arith.subf %53, %56 : vector<16x16xf32>
    %58 = vector.extract_strided_slice %52 {offsets = [0, 16], sizes = [16, 16], strides = [1, 1]} : vector<16x64xf32> to vector<16x16xf32>
    %cst_20 = arith.constant dense<0xFF800000> : vector<16xf32>
    %59 = vector.multi_reduction <maximumf>, %58, %cst_20 [1] : vector<16x16xf32> to vector<16xf32>
    %60 = vector.shape_cast %59 : vector<16xf32> to vector<16x1xf32>
    %61 = vector.broadcast %60 : vector<16x1xf32> to vector<16x16xf32>
    %62 = arith.subf %58, %61 : vector<16x16xf32>
    %63 = vector.extract_strided_slice %52 {offsets = [0, 32], sizes = [16, 16], strides = [1, 1]} : vector<16x64xf32> to vector<16x16xf32>
    %cst_21 = arith.constant dense<0xFF800000> : vector<16xf32>
    %64 = vector.multi_reduction <maximumf>, %63, %cst_21 [1] : vector<16x16xf32> to vector<16xf32>
    %65 = vector.shape_cast %64 : vector<16xf32> to vector<16x1xf32>
    %66 = vector.broadcast %65 : vector<16x1xf32> to vector<16x16xf32>
    %67 = arith.subf %63, %66 : vector<16x16xf32>
    %68 = vector.extract_strided_slice %52 {offsets = [0, 48], sizes = [16, 16], strides = [1, 1]} : vector<16x64xf32> to vector<16x16xf32>
    %cst_22 = arith.constant dense<0xFF800000> : vector<16xf32>
    %69 = vector.multi_reduction <maximumf>, %68, %cst_22 [1] : vector<16x16xf32> to vector<16xf32>
    %70 = vector.shape_cast %69 : vector<16xf32> to vector<16x1xf32>
    %71 = vector.broadcast %70 : vector<16x1xf32> to vector<16x16xf32>
    %72 = arith.subf %68, %71 : vector<16x16xf32>
    %73 = tpu.concatenate %57, %62, %67, %72 in 1 : vector<16x16xf32>, vector<16x16xf32>, vector<16x16xf32>, vector<16x16xf32> -> vector<16x64xf32>
    %74 = math.exp %73 : vector<16x64xf32>
    %cst_23 = arith.constant dense<0.000000e+00> : vector<16x64xf32>
    %75 = tpu.matmul %74, %49, %cst_23 {dimension_numbers = #tpu.dot_dimension_numbers<[1], [0], [0], [1], [0, 0, 1, 1], [], []>, precision = #tpu.contract_precision<fp32>} : vector<16x64xf32>, vector<64x64xf32>, vector<16x64xf32> -> vector<16x64xf32>
    %76 = vector.extract_strided_slice %75 {offsets = [0, 0], sizes = [16, 32], strides = [1, 1]} : vector<16x64xf32> to vector<16x32xf32>
    %77 = vector.extract_strided_slice %75 {offsets = [0, 32], sizes = [16, 32], strides = [1, 1]} : vector<16x64xf32> to vector<16x32xf32>
    %78 = arith.divf %76, %77 : vector<16x32xf32>
    %c0_24 = arith.constant 0 : index
    %c0_25 = arith.constant 0 : index
    %79 = vector.load %arg5[%c0_24, %c0_25] : memref<32x32xf32, #tpu.memory_space<vmem>>, vector<32x32xf32>
    %cst_26 = arith.constant dense<0.000000e+00> : vector<16x32xf32>
    %80 = tpu.matmul %78, %79, %cst_26 {dimension_numbers = #tpu.dot_dimension_numbers<[1], [0], [0], [1], [0, 0, 1, 1], [], []>, precision = #tpu.contract_precision<fp32>} : vector<16x32xf32>, vector<32x32xf32>, vector<16x32xf32> -> vector<16x32xf32>
    %81 = arith.addf %7, %80 : vector<16x32xf32>
    %cst_27 = arith.constant dense<0.000000e+00> : vector<16xf32>
    %82 = vector.multi_reduction <add>, %81, %cst_27 [1] : vector<16x32xf32> to vector<16xf32>
    %83 = vector.shape_cast %82 : vector<16xf32> to vector<16x1xf32>
    %cst_28 = arith.constant 3.200000e+01 : f32
    %84 = vector.broadcast %cst_28 : f32 to vector<16x1xf32>
    %85 = arith.divf %83, %84 : vector<16x1xf32>
    %86 = vector.broadcast %85 : vector<16x1xf32> to vector<16x32xf32>
    %87 = arith.subf %81, %86 : vector<16x32xf32>
    %88 = arith.mulf %87, %87 : vector<16x32xf32>
    %cst_29 = arith.constant dense<0.000000e+00> : vector<16xf32>
    %89 = vector.multi_reduction <add>, %88, %cst_29 [1] : vector<16x32xf32> to vector<16xf32>
    %90 = vector.shape_cast %89 : vector<16xf32> to vector<16x1xf32>
    %cst_30 = arith.constant 3.200000e+01 : f32
    %91 = vector.broadcast %cst_30 : f32 to vector<16x1xf32>
    %92 = arith.divf %90, %91 : vector<16x1xf32>
    %93 = vector.broadcast %85 : vector<16x1xf32> to vector<16x32xf32>
    %94 = arith.subf %81, %93 : vector<16x32xf32>
    %cst_31 = arith.constant 9.99999974E-6 : f32
    %95 = vector.broadcast %cst_31 : f32 to vector<16x1xf32>
    %96 = arith.addf %92, %95 : vector<16x1xf32>
    %97 = math.rsqrt %96 : vector<16x1xf32>
    %98 = vector.broadcast %97 : vector<16x1xf32> to vector<16x32xf32>
    %99 = arith.mulf %94, %98 : vector<16x32xf32>
    %100 = vector.broadcast %11 : vector<1x32xf32> to vector<16x32xf32>
    %101 = arith.mulf %99, %100 : vector<16x32xf32>
    %102 = vector.broadcast %12 : vector<1x32xf32> to vector<16x32xf32>
    %103 = arith.addf %101, %102 : vector<16x32xf32>
    %c0_32 = arith.constant 0 : index
    %c0_33 = arith.constant 0 : index
    %104 = vector.load %arg6[%c0_32, %c0_33] : memref<32x64xf32, #tpu.memory_space<vmem>>, vector<32x64xf32>
    %cst_34 = arith.constant dense<0.000000e+00> : vector<16x64xf32>
    %105 = tpu.matmul %103, %104, %cst_34 {dimension_numbers = #tpu.dot_dimension_numbers<[1], [0], [0], [1], [0, 0, 1, 1], [], []>, precision = #tpu.contract_precision<fp32>} : vector<16x32xf32>, vector<32x64xf32>, vector<16x64xf32> -> vector<16x64xf32>
    %cst_35 = arith.constant 5.000000e-01 : f32
    %106 = vector.broadcast %cst_35 : f32 to vector<16x64xf32>
    %107 = arith.mulf %106, %105 : vector<16x64xf32>
    %cst_36 = arith.constant 4.471500e-02 : f32
    %108 = vector.broadcast %cst_36 : f32 to vector<16x64xf32>
    %109 = arith.mulf %108, %105 : vector<16x64xf32>
    %110 = arith.mulf %109, %105 : vector<16x64xf32>
    %111 = arith.mulf %110, %105 : vector<16x64xf32>
    %112 = arith.addf %105, %111 : vector<16x64xf32>
    %cst_37 = arith.constant 0.797884583 : f32
    %113 = vector.broadcast %cst_37 : f32 to vector<16x64xf32>
    %114 = arith.mulf %113, %112 : vector<16x64xf32>
    %115 = math.tanh %114 : vector<16x64xf32>
    %cst_38 = arith.constant 1.000000e+00 : f32
    %116 = vector.broadcast %cst_38 : f32 to vector<16x64xf32>
    %117 = arith.addf %116, %115 : vector<16x64xf32>
    %118 = arith.mulf %107, %117 : vector<16x64xf32>
    %c0_39 = arith.constant 0 : index
    %c0_40 = arith.constant 0 : index
    %119 = vector.load %arg7[%c0_39, %c0_40] : memref<64x32xf32, #tpu.memory_space<vmem>>, vector<64x32xf32>
    %cst_41 = arith.constant dense<0.000000e+00> : vector<16x32xf32>
    %120 = tpu.matmul %118, %119, %cst_41 {dimension_numbers = #tpu.dot_dimension_numbers<[1], [0], [0], [1], [0, 0, 1, 1], [], []>, precision = #tpu.contract_precision<fp32>} : vector<16x64xf32>, vector<64x32xf32>, vector<16x32xf32> -> vector<16x32xf32>
    %121 = arith.addf %81, %120 : vector<16x32xf32>
    %cst_42 = arith.constant dense<0.000000e+00> : vector<16xf32>
    %122 = vector.multi_reduction <add>, %121, %cst_42 [1] : vector<16x32xf32> to vector<16xf32>
    %123 = vector.shape_cast %122 : vector<16xf32> to vector<16x1xf32>
    %cst_43 = arith.constant 3.200000e+01 : f32
    %124 = vector.broadcast %cst_43 : f32 to vector<16x1xf32>
    %125 = arith.divf %123, %124 : vector<16x1xf32>
    %126 = vector.broadcast %125 : vector<16x1xf32> to vector<16x32xf32>
    %127 = arith.subf %121, %126 : vector<16x32xf32>
    %128 = arith.mulf %127, %127 : vector<16x32xf32>
    %cst_44 = arith.constant dense<0.000000e+00> : vector<16xf32>
    %129 = vector.multi_reduction <add>, %128, %cst_44 [1] : vector<16x32xf32> to vector<16xf32>
    %130 = vector.shape_cast %129 : vector<16xf32> to vector<16x1xf32>
    %cst_45 = arith.constant 3.200000e+01 : f32
    %131 = vector.broadcast %cst_45 : f32 to vector<16x1xf32>
    %132 = arith.divf %130, %131 : vector<16x1xf32>
    %133 = vector.broadcast %125 : vector<16x1xf32> to vector<16x32xf32>
    %134 = arith.subf %121, %133 : vector<16x32xf32>
    %cst_46 = arith.constant 9.99999974E-6 : f32
    %135 = vector.broadcast %cst_46 : f32 to vector<16x1xf32>
    %136 = arith.addf %132, %135 : vector<16x1xf32>
    %137 = math.rsqrt %136 : vector<16x1xf32>
    %138 = vector.broadcast %137 : vector<16x1xf32> to vector<16x32xf32>
    %139 = arith.mulf %134, %138 : vector<16x32xf32>
    %140 = vector.broadcast %13 : vector<1x32xf32> to vector<16x32xf32>
    %141 = arith.mulf %139, %140 : vector<16x32xf32>
    %142 = vector.broadcast %14 : vector<1x32xf32> to vector<16x32xf32>
    %143 = arith.addf %141, %142 : vector<16x32xf32>
    %c0_47 = arith.constant 0 : index
    %c0_48 = arith.constant 0 : index
    %144 = vector.load %arg8[%c0_47, %c0_48] : memref<32x128xf32, #tpu.memory_space<vmem>>, vector<32x128xf32>
    %cst_49 = arith.constant dense<0.000000e+00> : vector<16x128xf32>
    %145 = tpu.matmul %143, %144, %cst_49 {dimension_numbers = #tpu.dot_dimension_numbers<[1], [0], [0], [1], [0, 0, 1, 1], [], []>, precision = #tpu.contract_precision<fp32>} : vector<16x32xf32>, vector<32x128xf32>, vector<16x128xf32> -> vector<16x128xf32>
    %c0_50 = arith.constant 0 : index
    %c0_51 = arith.constant 0 : index
    %146 = vector.load %arg11[%c0_50, %c0_51] : memref<16x128xf32, #tpu.memory_space<vmem>>, vector<16x128xf32>
    tpu.vector_store %arg11[%c0_50, %c0_51], %145 {strides = array<i32>} : memref<16x128xf32, #tpu.memory_space<vmem>>, vector<16x128xf32>,
    return
  }
  func.func @transform_0(%arg0: i32) -> (i32, i32) {
    %c0_i32 = arith.constant 0 : i32
    %c0_i32_0 = arith.constant 0 : i32
    return %arg0, %c0_i32 : i32, i32
  }
  func.func @transform_1(%arg0: i32) -> (i32, i32) {
    %c0_i32 = arith.constant 0 : i32
    %c0_i32_0 = arith.constant 0 : i32
    %c0_i32_1 = arith.constant 0 : i32
    return %c0_i32, %c0_i32_0 : i32, i32
  }
  func.func @transform_2(%arg0: i32) -> (i32, i32) {
    %c0_i32 = arith.constant 0 : i32
    %c0_i32_0 = arith.constant 0 : i32
    %c0_i32_1 = arith.constant 0 : i32
    return %c0_i32, %c0_i32_0 : i32, i32
  }
  func.func @transform_3(%arg0: i32) -> (i32, i32) {
    %c0_i32 = arith.constant 0 : i32
    %c0_i32_0 = arith.constant 0 : i32
    %c0_i32_1 = arith.constant 0 : i32
    return %c0_i32, %c0_i32_0 : i32, i32
  }
  func.func @transform_4(%arg0: i32) -> (i32, i32) {
    %c0_i32 = arith.constant 0 : i32
    %c0_i32_0 = arith.constant 0 : i32
    %c0_i32_1 = arith.constant 0 : i32
    return %c0_i32, %c0_i32_0 : i32, i32
  }
  func.func @transform_5(%arg0: i32) -> (i32, i32) {
    %c0_i32 = arith.constant 0 : i32
    %c0_i32_0 = arith.constant 0 : i32
    %c0_i32_1 = arith.constant 0 : i32
    return %c0_i32, %c0_i32_0 : i32, i32
  }
  func.func @transform_6(%arg0: i32) -> (i32, i32) {
    %c0_i32 = arith.constant 0 : i32
    %c0_i32_0 = arith.constant 0 : i32
    %c0_i32_1 = arith.constant 0 : i32
    return %c0_i32, %c0_i32_0 : i32, i32
  }
  func.func @transform_7(%arg0: i32) -> (i32, i32) {
    %c0_i32 = arith.constant 0 : i32
    %c0_i32_0 = arith.constant 0 : i32
    %c0_i32_1 = arith.constant 0 : i32
    return %c0_i32, %c0_i32_0 : i32, i32
  }
  func.func @transform_8(%arg0: i32) -> (i32, i32) {
    %c0_i32 = arith.constant 0 : i32
    %c0_i32_0 = arith.constant 0 : i32
    %c0_i32_1 = arith.constant 0 : i32
    return %c0_i32, %c0_i32_0 : i32, i32
  }
  func.func @transform_9(%arg0: i32) -> (i32, i32) {
    %c0_i32 = arith.constant 0 : i32
    %c0_i32_0 = arith.constant 0 : i32
    %c0_i32_1 = arith.constant 0 : i32
    return %c0_i32, %c0_i32_0 : i32, i32
  }
  func.func @transform_10(%arg0: i32) -> (i32, i32) {
    %c0_i32 = arith.constant 0 : i32
    %c0_i32_0 = arith.constant 0 : i32
    return %arg0, %c0_i32 : i32, i32
  }
}

</mosaic_0001>

<bundles_post_ra>
// kernel: _actor_forward_impl.1
= control target key start
LH: loop header
LB: loop body
LE: loop exit
PB: predicated region body
PF: predicated region fallthrough
CT: control target
= control target key end

     0   :  { %15 = vsyncpa [#allocation3], 0  ;;  %s6771_s13 = smov [#allocation2]   ;;  %s7562_s0 = inlined_call_operand.vmem [shape: s32[16,1], index: 0, kind: input, shape index: {}]   ;;  %s7563_s1 = inlined_call_operand.vmem [shape: f32[64,32], index: 1, kind: input, shape index: {}]   ;;  %s7564_s2 = inlined_call_operand.hbm [shape: f32[8,32], index: 2, kind: input, shape index: {}]   ;;  %s7565_s3 = inlined_call_operand.vmem [shape: f32[32,96], index: 3, kind: input, shape index: {}]   ;;  %s7566_s4 = inlined_call_operand.vmem [shape: f32[32,32], index: 4, kind: input, shape index: {}]   ;;  %s7567_s5 = inlined_call_operand.vmem [shape: f32[32,64], index: 5, kind: input, shape index: {}]   ;;  %s7568_s6 = inlined_call_operand.vmem [shape: f32[64,32], index: 6, kind: input, shape index: {}]   ;;  %s7569_s7 = inlined_call_operand.vmem [shape: f32[32,128], index: 7, kind: input, shape index: {}]   ;;  %s7570_s8 = inlined_call_operand.vmem [shape: f32[64,32], index: 8, kind: input, shape index: {}]   ;;  %s7571_s9 = inlined_call_operand.vmem [shape: f32[16,64], index: 9, kind: input, shape index: {}]   ;;  %s7572_s10 = inlined_call_operand.vmem [shape: f32[16,128], index: 10, kind: output, shape index: {}]  }
   0x1   :  { %s26_s14 = sshll.u32 %s6771_s13, 4  ;;  %s6747_s17 = scalar_lea.hbm %s7564_s2, 128  ;;  %s27_s14 = int_to_ptr.vmem [resolvable:$true] %s26_s14 }
   0x2   :  { %p6748_p0 = scmp.ne.s32.totalorder %s7564_s2, %s6747_s17  ;;  %p6751_p1 = scmp.lt.u32.totalorder %s6747_s17, %s7564_s2 }
   0x4   :  { %p6753_p2 = pnand %p6751_p1, %p6748_p0 }
   0x6   :  { %6756 = shalt.err (!%p6753_p2)
}
   0x7   :  { %s6757_s22 = scalar_lea.vmem %s27_s14, 128  ;;  %p6762_p4 = scmp.lt.s32.totalorder %s27_s14, %s27_s14 }
   0x8   :  { %p6758_p3 = scmp.ne.s32.totalorder %s27_s14, %s6757_s22  ;;  %p6763_p5 = scmp.lt.s32.totalorder %s6757_s22, %s6757_s22 }
   0xa   :  { %p6764_p6 = por %p6763_p5, %p6762_p4 }
   0xc   :  { %p6765_p7 = pnand %p6764_p6, %p6758_p3 }
   0xe   :  { %6768 = shalt.err (!%p6765_p7)
}
   0xf   :  { %29 = dma.hbm_to_vmem [thread:$0]  %s7564_s2, 128, %s27_s14, [#allocation3]  }
  0x10   :  { %6769 = dma.done.wait [#allocation3], 128  }
  0x11   :  { %6770 = vsyncadd [#allocation3], 4294967168  ;;  %v6772_v0 = vmov 0   ;;  %v47_v1 = vld [vmem:[%s7562_s0] sm:$0xff]  ;;  %v64_v3 = vld [vmem:[%s7563_s1 + $0x8] sm:$0xff]  ;;  %vm71_vm0 = vcmask 523264  }
  0x12   :  { %6721 = vset.pattern.permute.xlu0 %v6772_v0  ;;  %v63_v2 = vld [vmem:[%s7563_s1] sm:$0xff]  ;;  %v65_v5 = vld [vmem:[%s7563_s1 + $0x10] sm:$0xff]  ;;  %v66_v6 = vld [vmem:[%s7563_s1 + $0x18] sm:$0xff]  ;;  %v82_v8 = vand.u32 4294901760, %v64_v3  ;;  %vm659_vm3 = vcmask 261120   ;;  %s6774_s11 = smov 32  }
  0x13   :  { %52 = vperm.xlu0 %6721, %v47_v1   ;;  %v79_v4 = vand.u32 4294901760, %v63_v2  ;;  %v48_v7 = vld [vmem:[%s7562_s0 + $0x8] sm:$0xff]  ;;  %v85_v9 = vand.u32 4294901760, %v65_v5  ;;  %v88_v10 = vand.u32 4294901760, %v66_v6  ;;  %v67_v11 = vld [vmem:[%s7563_s1 + $0x20] sm:$0xff]  ;;  %v69_v19 = vld [vmem:[%s7563_s1 + $0x30] sm:$0xff] }
  0x14   :  { %v68_v12 = vld [vmem:[%s7563_s1 + $0x28] sm:$0xff]  ;;  %v91_v15 = vand.u32 4294901760, %v67_v11  ;;  %v180_v18 = vsub.f32 %v64_v3, %v82_v8  ;;  %v70_v20 = vld [vmem:[%s7563_s1 + $0x38] sm:$0xff]  ;;  %v97_v24 = vand.u32 4294901760, %v69_v19  ;;  %v49_v3 = vlaneseq  ;;  %s6776_s23 = smov 64  }
  0x15   :  { %v6868_v13 = vpack.c.bf16 %v82_v8, %v79_v4  ;;  %v6870_v14 = vpack.c.bf16 %v88_v10, %v85_v9  ;;  %v94_v16 = vand.u32 4294901760, %v68_v12  ;;  %v173_v17 = vsub.f32 %v63_v2, %v79_v4 }
  0x16   :  { %v181_v22 = vand.u32 4294901760, %v180_v18  ;;  %v100_v25 = vand.u32 4294901760, %v70_v20  ;;  %v187_v28 = vsub.f32 %v65_v5, %v85_v9  ;;  %v194_v29 = vsub.f32 %v66_v6, %v88_v10 }
  0x17   :  { %55 = vperm.xlu0 %6721, %v48_v7   ;;  %6058 = vmatprep.subr.bf16.mxu0 %v6868_v13  ;;  %v174_v21 = vand.u32 4294901760, %v173_v17  ;;  %v6881_v23 = vpack.c.bf16 %v94_v16, %v91_v15  ;;  %v201_v37 = vsub.f32 %v67_v11, %v91_v15  ;;  %v208_v38 = vsub.f32 %v68_v12, %v94_v16 }
  0x18   :  { %6060 = vmatpush3.bf16.msra.mxu0 %v6868_v13  ;;  %v182_v27 = vsub.f32 %v180_v18, %v181_v22  ;;  %v6885_v32 = vpack.c.bf16 %v100_v25, %v97_v24  ;;  %v188_v33 = vand.u32 4294901760, %v187_v28  ;;  %v195_v34 = vand.u32 4294901760, %v194_v29 }
  0x19   :  { %6062 = vmatprep.subr.bf16.mxu0 %v6870_v14  ;;  %v175_v26 = vsub.f32 %v173_v17, %v174_v21  ;;  %v202_v42 = vand.u32 4294901760, %v201_v37  ;;  %v209_v43 = vand.u32 4294901760, %v208_v38  ;;  %v215_v47 = vsub.f32 %v69_v19, %v97_v24 }
  0x1a   :  { %v183_v31 = vand.u32 4294901760, %v182_v27  ;;  %v189_v35 = vsub.f32 %v187_v28, %v188_v33  ;;  %v196_v36 = vsub.f32 %v194_v29, %v195_v34  ;;  %v222_v48 = vsub.f32 %v70_v20, %v100_v25 }
  0x1b   :  { %v176_v30 = vand.u32 4294901760, %v175_v26  ;;  %v203_v45 = vsub.f32 %v201_v37, %v202_v42  ;;  %v210_v46 = vsub.f32 %v208_v38, %v209_v43  ;;  %v216_v51 = vand.u32 4294901760, %v215_v47 }
  0x1c   :  { %6064 = vmatpush3.bf16.msra.mxu0 %v6870_v14  ;;  %v190_v40 = vand.u32 4294901760, %v189_v35  ;;  %v197_v41 = vand.u32 4294901760, %v196_v36  ;;  %v223_v52 = vand.u32 4294901760, %v222_v48  ;;  %v6089_v59 = vpack.c.bf16 %v180_v18, %v173_v17  ;;  %v700_v35 = vld [vmem:[%s7565_s3 + $0x8] sm:$0xff]  ;;  %v701_v36 = vld [vmem:[%s7565_s3 + $0x10] sm:$0xff] }
  0x1d   :  { %6066 = vmatprep.subr.bf16.mxu0 %v6881_v23  ;;  %v6073_v39 = vpack.c.bf16 %v183_v31, %v176_v30  ;;  %v204_v49 = vand.u32 4294901760, %v203_v45  ;;  %v211_v50 = vand.u32 4294901760, %v210_v46  ;;  %v217_v54 = vsub.f32 %v215_v47, %v216_v51 }
  0x1e   :  { %v6077_v44 = vpack.c.bf16 %v197_v41, %v190_v40  ;;  %v224_v55 = vsub.f32 %v222_v48, %v223_v52  ;;  %v6093_v60 = vpack.c.bf16 %v194_v29, %v187_v28  ;;  %v6097_v61 = vpack.c.bf16 %v208_v38, %v201_v37 }
  0x1f   :  { %v6081_v53 = vpack.c.bf16 %v211_v50, %v204_v49  ;;  %v218_v56 = vand.u32 4294901760, %v217_v54  ;;  %v6101_v62 = vpack.c.bf16 %v222_v48, %v215_v47  ;;  %v6121_v63 = vpack.c.bf16 %v181_v22, %v174_v21 }
  0x20   :  { %6068 = vmatpush3.bf16.msra.mxu0 %v6881_v23  ;;  %v225_v57 = vand.u32 4294901760, %v224_v55  ;;  %v6125_v0 = vpack.c.bf16 %v195_v34, %v188_v33  ;;  %v6129_v1 = vpack.c.bf16 %v209_v43, %v202_v42  ;;  %v6133_v2 = vpack.c.bf16 %v223_v52, %v216_v51  ;;  %v699_v34 = vld [vmem:[%s7565_s3] sm:$0xff] }
  0x21   :  { %6070 = vmatprep.subr.bf16.mxu0 %v6885_v32  ;;  %v50_v4 = vand.u32 127, %v49_v3  ;;  %v6773_v6 = vmov 0.0   ;;  %v710_v37 = vand.u32 4294901760, %v699_v34  ;;  %v713_v38 = vand.u32 4294901760, %v700_v35 }
  0x22   :  { %v6085_v58 = vpack.c.bf16 %v225_v57, %v218_v56  ;;  %v716_v40 = vand.u32 4294901760, %v701_v36  ;;  %vm1987_vm4 = vcmask 130048   ;;  %vm1996_vm5 = vcmask 261248  }
  0x23   :  { %v6947_v42 = vpack.c.bf16 %v713_v38, %v710_v37  ;;  %v807_v45 = vsub.f32 %v700_v35, %v713_v38  ;;  %vm2005_vm6 = vcmask 392448   ;;  %vm2014_vm7 = vcmask 523648  }
  0x24   :  { %6072 = vmatpush3.bf16.msra.mxu0 %v6885_v32  ;;  %v814_v50 = vsub.f32 %v701_v36, %v716_v40  ;;  %vm2027_vm8 = vcmask 392192  }
  0x25   :  { %6074 = vmatprep.subr.bf16.mxu0 %v6073_v39  ;;  %6154 = vmatprep.subr.bf16.mxu1 %v6947_v42  ;;  %v808_v47 = vand.u32 4294901760, %v807_v45 }
  0x26   :  { %6156 = vmatpush3.bf16.msra.mxu1 %v6947_v42  ;;  %v815_v54 = vand.u32 4294901760, %v814_v50 }
  0x27   :  { %v809_v49 = vsub.f32 %v807_v45, %v808_v47 }
  0x28   :  { %v816_v57 = vsub.f32 %v814_v50, %v815_v54 }
  0x92   :  { %v53_v5 = vpop.permute.xlu0 %52 }
  0x93   :  { %vm57_vm1 = vcmp.eq.s32.totalorder %v50_v4, %v53_v5  ;;  %v6978_v5 = vld [vmem:[%s7570_s8 + $0x20] sm:$0xff] }
  0x94   :  { %v4945_v7 = vsel %vm57_vm1, 1.0, %v6773_v6 }
  0x95   :  { %v73_v8 = vsel %vm71_vm0, %v4945_v7, 0 }
  0x96   :  { %v56_v9 = vpop.permute.xlu0 %55  ;;  %v152_v10 = vsub.f32 %v73_v8, %v73_v8  ;;  %v6997_v8 = vld [vmem:[%s7570_s8 + $0x28] sm:$0xff] }
  0x97   :  { %vm58_vm2 = vcmp.eq.s32.totalorder %v50_v4, %v56_v9  ;;  %v6973_v4 = vld [vmem:[%s7570_s8 + $0x8] sm:$0xff]  ;;  %v7003_v9 = vld [vmem:[%s7570_s8 + $0x30] sm:$0xff] }
  0x98   :  { %v4946_v11 = vsel %vm58_vm2, 1.0, %v6773_v6  ;;  %v153_v12 = vand.u32 4294901760, %v152_v10  ;;  %v6985_v6 = vld [vmem:[%s7570_s8 + $0x10] sm:$0xff] }
  0x99   :  { %v76_v15 = vsel %vm71_vm0, %v4946_v11, 0 }
  0x9a   :  { %v162_v16 = vsub.f32 %v76_v15, %v76_v15  ;;  %v154_v17 = vsub.f32 %v152_v10, %v153_v12 }
  0x9c   :  { %v155_v18 = vand.u32 4294901760, %v154_v17  ;;  %v163_v19 = vand.u32 4294901760, %v162_v16 }
  0x9e   :  { %5353 = vmatprep.mubr.f32.mxu0 %v155_v18  ;;  %v164_v20 = vsub.f32 %v162_v16, %v163_v19  ;;  %v7013_v18 = vshrl.u32 %v49_v3, 7 }
  0xa0   :  { %v165_v21 = vand.u32 4294901760, %v164_v20  ;;  %v689_v20 = vsub.s32 0, %v7013_v18 }
  0xa2   :  { %5354 = vmatmul.mubr.f32.vlgmr.msra.gmra.mrb[0].mxu0 %v165_v21  ;;  %v658_v21 = vld [vmem:[#allocation2] sm:$0xff] }
  0xa3   :  { %6076 = vmatpush3.bf16.msra.mxu0 %v6073_v39  ;;  %5372 = vmatprep.mubr.msk.f32.mxu0 %vm71_vm0, %v4945_v7  ;;  %v702_v39 = vld [vmem:[%s7565_s3 + $0x18] sm:$0xff] }
  0xa4   :  { %6078 = vmatprep.subr.bf16.mxu0 %v6077_v44  ;;  %v719_v41 = vand.u32 4294901760, %v702_v39 }
  0xa6   :  { %v6949_v43 = vpack.c.bf16 %v719_v41, %v716_v40  ;;  %v821_v51 = vsub.f32 %v702_v39, %v719_v41 }
  0xa7   :  { %6080 = vmatpush3.bf16.msra.mxu0 %v6077_v44  ;;  %v800_v44 = vsub.f32 %v699_v34, %v710_v37 }
  0xa8   :  { %6082 = vmatprep.subr.bf16.mxu0 %v6081_v53  ;;  %6158 = vmatprep.subr.bf16.mxu1 %v6949_v43  ;;  %v822_v55 = vand.u32 4294901760, %v821_v51 }
  0xa9   :  { %v801_v46 = vand.u32 4294901760, %v800_v44  ;;  %6160 = vmatpush3.bf16.msra.mxu1 %v6949_v43 }
  0xab   :  { %6084 = vmatpush3.bf16.msra.mxu0 %v6081_v53  ;;  %v802_v48 = vsub.f32 %v800_v44, %v801_v46  ;;  %v810_v53 = vand.u32 4294901760, %v809_v49 }
  0xac   :  { %6086 = vmatprep.subr.bf16.mxu0 %v6085_v58 }
  0xad   :  { %v803_v52 = vand.u32 4294901760, %v802_v48 }
  0xaf   :  { %6088 = vmatpush3.bf16.msra.mxu0 %v6085_v58  ;;  %v6955_v56 = vpack.c.bf16 %v810_v53, %v803_v52  ;;  %v823_v58 = vsub.f32 %v821_v51, %v822_v55 }
  0xb0   :  { %6090 = vmatprep.subr.bf16.mxu0 %v6089_v59 }
  0xb1   :  { %6162 = vmatprep.subr.bf16.mxu1 %v6955_v56 }
  0xb2   :  { %5373 = vmatmul.mubr.msk.f32.vlgmr.msra.gmra.mrb[0].mxu0 %vm71_vm0, %v4946_v11 }
  0xb3   :  { %6092 = vmatpush3.bf16.msra.mxu0 %v6089_v59  ;;  %5391 = vmatprep.mubr.f32.mxu0 %v152_v10  ;;  %v817_v59 = vand.u32 4294901760, %v816_v57  ;;  %v7009_v10 = vld [vmem:[%s7570_s8 + $0x38] sm:$0xff] }
  0xb4   :  { %6094 = vmatprep.subr.bf16.mxu0 %v6093_v60 }
  0xb7   :  { %6096 = vmatpush3.bf16.msra.mxu0 %v6093_v60  ;;  %v824_v60 = vand.u32 4294901760, %v823_v58 }
  0xb8   :  { %6098 = vmatprep.subr.bf16.mxu0 %v6097_v61 }
  0xbb   :  { %6100 = vmatpush3.bf16.msra.mxu0 %v6097_v61  ;;  %v6165_v61 = vpack.c.bf16 %v824_v60, %v817_v59 }
  0xbc   :  { %6102 = vmatprep.subr.bf16.mxu0 %v6101_v62 }
  0xbf   :  { %6104 = vmatpush3.bf16.msra.mxu0 %v6101_v62  ;;  %v6169_v62 = vpack.c.bf16 %v807_v45, %v800_v44 }
  0xc0   :  { %6106 = vmatprep.subr.bf16.mxu0 %v6868_v13 }
  0xc2   :  { %5392 = vmatmul.mubr.f32.vlgmr.msra.gmra.mrb[0].mxu0 %v162_v16 }
  0xc3   :  { %6108 = vmatpush3.bf16.msra.mxu0 %v6868_v13  ;;  %5410 = vmatprep.mubr.f32.mxu0 %v153_v12 }
  0xc4   :  { %6110 = vmatprep.subr.bf16.mxu0 %v6870_v14 }
  0xc7   :  { %6112 = vmatpush3.bf16.msra.mxu0 %v6870_v14 }
  0xc8   :  { %6114 = vmatprep.subr.bf16.mxu0 %v6881_v23 }
  0xcb   :  { %6116 = vmatpush3.bf16.msra.mxu0 %v6881_v23 }
  0xcc   :  { %6118 = vmatprep.subr.bf16.mxu0 %v6885_v32 }
  0xcf   :  { %6120 = vmatpush3.bf16.msra.mxu0 %v6885_v32 }
  0xd0   :  { %6122 = vmatprep.subr.bf16.mxu0 %v6121_v63 }
  0xd2   :  { %5411 = vmatmul.mubr.f32.vlgmr.msra.gmra.mrb[0].mxu0 %v163_v19 }
  0xd3   :  { %6124 = vmatpush3.bf16.msra.mxu0 %v6121_v63  ;;  %5429 = vmatprep.mubr.msk.f32.mxu0 %vm71_vm0, %v4945_v7  ;;  %v6958_v63 = vpack.c.bf16 %v821_v51, %v814_v50 }
  0xd4   :  { %6126 = vmatprep.subr.bf16.mxu0 %v6125_v0 }
  0xd7   :  { %6128 = vmatpush3.bf16.msra.mxu0 %v6125_v0  ;;  %v6960_v0 = vpack.c.bf16 %v808_v47, %v801_v46 }
  0xd8   :  { %6130 = vmatprep.subr.bf16.mxu0 %v6129_v1 }
  0xdb   :  { %6132 = vmatpush3.bf16.msra.mxu0 %v6129_v1  ;;  %v6962_v1 = vpack.c.bf16 %v822_v55, %v815_v54 }
  0xdc   :  { %6134 = vmatprep.subr.bf16.mxu0 %v6133_v2 }
  0xdf   :  { %6136 = vmatpush3.bf16.msra.mxu0 %v6133_v2  ;;  %v6967_v2 = vld [vmem:[%s7570_s8] sm:$0xff] }
  0xe0   :  { %6138 = vmatprep.subr.bf16.mxu0 %v6868_v13 }
  0xe2   :  { %5430 = vmatmul.mubr.msk.f32.vlgmr.msra.gmra.mrb[0].mxu0 %vm71_vm0, %v4946_v11 }
  0xe3   :  { %6140 = vmatpush3.bf16.msra.mxu0 %v6868_v13  ;;  %5448 = vmatprep.mubr.msk.f32.mxu0 %vm71_vm0, %v4945_v7  ;;  %v6991_v7 = vld [vmem:[%s7570_s8 + $0x18] sm:$0xff]  ;;  %s6775_s8 = smov 96  }
  0xe4   :  { %6142 = vmatprep.subr.bf16.mxu0 %v6870_v14 }
  0xe7   :  { %6144 = vmatpush3.bf16.msra.mxu0 %v6870_v14 }
  0xe8   :  { %6146 = vmatprep.subr.bf16.mxu0 %v6881_v23 }
  0xeb   :  { %6148 = vmatpush3.bf16.msra.mxu0 %v6881_v23 }
  0xec   :  { %6150 = vmatprep.subr.bf16.mxu0 %v6885_v32 }
  0xef   :  { %6152 = vmatpush3.bf16.msra.mxu0 %v6885_v32 }
  0xf2   :  { %5449 = vmatmul.mubr.msk.f32.vlgmr.msra.gmra.mrb[0].mxu0 %vm71_vm0, %v4946_v11 }
 0x1c5   :  { %v6915_v22 = vpop.f32.mrb[0].mxu0 }
 0x1c6   :  { %v6917_v13 = vpop.f32.mrb[1].mxu0  ;;  %v663_v14 = vsel %vm659_vm3, %v6915_v22, 0.0 }
 0x1c7   :  { %v660_v24 = vsel %vm659_vm3, %v6917_v13, 0.0 }
 0x1c8   :  { %661 = vadd.xlane.f32.xlu1 %v660_v24  ;;  %v695_v24 = vsub.s32 1, %v7013_v18 }
 0x1cc   :  { %664 = vadd.xlane.f32.xlu1 %v663_v14  ;;  %v690_v14 = vrot.slane %v658_v21, %v689_v20 }
 0x255   :  { %v662_v23 = vpop.xlane.xlu1 %661 }
 0x256   :  { %v667_v25 = vmul.f32 0.03125, %v662_v23 }
 0x258   :  { %v6924_v26 = vsub.f32 %v6917_v13, %v667_v25 }
 0x259   :  { %v665_v27 = vpop.xlane.xlu1 %664 }
 0x25a   :  { %v668_v28 = vmul.f32 0.03125, %v665_v27  ;;  %v671_v29 = vmul.f32 %v6924_v26, %v6924_v26  ;;  %v696_v27 = vrot.slane %v658_v21, %v695_v24 }
 0x25c   :  { %v6929_v30 = vsub.f32 %v6915_v22, %v668_v28  ;;  %v673_v31 = vsel %vm659_vm3, %v671_v29, 0.0 }
 0x25d   :  { %674 = vadd.xlane.f32.xlu0 %v673_v31 }
 0x25e   :  { %v672_v32 = vmul.f32 %v6929_v30, %v6929_v30 }
 0x260   :  { %v676_v33 = vsel %vm659_vm3, %v672_v32, 0.0 }
 0x261   :  { %677 = vadd.xlane.f32.xlu1 %v676_v33 }
 0x272   :  { %1255 = vrot.lane.b32.xlu1 %v6967_v2, %s6774_s11 }
 0x273   :  { %1263 = vrot.lane.b32.xlu0 %v6978_v5, %s6774_s11 }
 0x276   :  { %1257 = vrot.lane.b32.xlu1 %v6973_v4, %s6774_s11 }
 0x27a   :  { %1259 = vrot.lane.b32.xlu1 %v6985_v6, %s6774_s11 }
 0x27e   :  { %1261 = vrot.lane.b32.xlu1 %v6991_v7, %s6774_s11 }
 0x282   :  { %1265 = vrot.lane.b32.xlu1 %v6997_v8, %s6774_s11 }
 0x286   :  { %1267 = vrot.lane.b32.xlu1 %v7003_v9, %s6774_s11 }
 0x28a   :  { %1269 = vrot.lane.b32.xlu1 %v7009_v10, %s6774_s11 }
 0x2ea   :  { %v675_v11 = vpop.xlane.xlu0 %674 }
 0x2eb   :  { %v679_v12 = vmul.f32 0.03125, %v675_v11 }
 0x2ed   :  { %v681_v15 = vadd.f32 1e-05, %v679_v12 }
 0x2ee   :  { %v678_v16 = vpop.xlane.xlu1 %677  ;;  %v7054_v53 = vpop.permute.xlu0 %1263 }
 0x2ef   :  { %6722 = vrsqrt.f32 %v681_v15  ;;  %v680_v17 = vmul.f32 0.03125, %v678_v16 }
 0x2f1   :  { %v682_v19 = vadd.f32 1e-05, %v680_v17 }
 0x2f3   :  { %6724 = vrsqrt.f32 %v682_v19 }
 0x2f9   :  { %v6723_v23 = vpop.eup %6722 }
 0x2fa   :  { %v685_v25 = vmul.f32 %v6723_v23, %v6924_v26 }
 0x2fc   :  { %v691_v28 = vmul.f32 %v690_v14, %v685_v25 }
 0x2fd   :  { %v6725_v29 = vpop.eup %6724 }
 0x2fe   :  { %v686_v31 = vmul.f32 %v6725_v29, %v6929_v30  ;;  %v697_v32 = vadd.f32 %v696_v27, %v691_v28  ;;  %v7036_v30 = vpop.permute.xlu1 %1255 }
 0x300   :  { %v704_v3 = vsel %vm659_vm3, %v697_v32, 0  ;;  %v692_v33 = vmul.f32 %v690_v14, %v686_v31 }
 0x301   :  { %v778_v34 = vand.u32 4294901760, %v704_v3 }
 0x302   :  { %v698_v35 = vadd.f32 %v696_v27, %v692_v33  ;;  %v7038_v47 = vpop.permute.xlu1 %1257 }
 0x303   :  { %v779_v36 = vsub.f32 %v704_v3, %v778_v34 }
 0x304   :  { %v707_v37 = vsel %vm659_vm3, %v698_v35, 0 }
 0x305   :  { %v780_v38 = vand.u32 4294901760, %v779_v36  ;;  %v788_v39 = vand.u32 4294901760, %v707_v37 }
 0x306   :  { %v7040_v48 = vpop.permute.xlu1 %1259 }
 0x307   :  { %v781_v40 = vsub.f32 %v779_v36, %v780_v38  ;;  %v789_v41 = vsub.f32 %v707_v37, %v788_v39 }
 0x309   :  { %v782_v44 = vand.u32 4294901760, %v781_v40  ;;  %v790_v26 = vand.u32 4294901760, %v789_v41 }
 0x30a   :  { %v7042_v49 = vpop.permute.xlu1 %1261 }
 0x30b   :  { %5459 = vmatprep.mubr.f32.mxu1 %v782_v44  ;;  %v791_v45 = vsub.f32 %v789_v41, %v790_v26 }
 0x30d   :  { %v792_v46 = vand.u32 4294901760, %v791_v45 }
 0x30f   :  { %5460 = vmatmul.mubr.f32.vlgmr.msra.gmra.mrb[0].mxu1 %v792_v46 }
 0x310   :  { %6164 = vmatpush3.bf16.msra.mxu1 %v6955_v56  ;;  %5470 = vmatprep.mubr.f32.mxu1 %v778_v34 }
 0x311   :  { %6166 = vmatprep.subr.bf16.mxu1 %v6165_v61 }
 0x314   :  { %6168 = vmatpush3.bf16.msra.mxu1 %v6165_v61 }
 0x315   :  { %6170 = vmatprep.subr.bf16.mxu1 %v6169_v62 }
 0x317   :  { %5471 = vmatmul.mubr.f32.vlgmr.msra.gmra.mrb[0].mxu1 %v788_v39 }
 0x318   :  { %6172 = vmatpush3.bf16.msra.mxu1 %v6169_v62  ;;  %5481 = vmatprep.mubr.f32.mxu1 %v779_v36 }
 0x319   :  { %6174 = vmatprep.subr.bf16.mxu1 %v6958_v63 }
 0x31c   :  { %6176 = vmatpush3.bf16.msra.mxu1 %v6958_v63 }
 0x31d   :  { %6178 = vmatprep.subr.bf16.mxu1 %v6947_v42 }
 0x31f   :  { %5482 = vmatmul.mubr.f32.vlgmr.msra.gmra.mrb[0].mxu1 %v789_v41 }
 0x320   :  { %6180 = vmatpush3.bf16.msra.mxu1 %v6947_v42  ;;  %5492 = vmatprep.mubr.f32.mxu1 %v780_v38 }
 0x321   :  { %6182 = vmatprep.subr.bf16.mxu1 %v6949_v43 }
 0x324   :  { %6184 = vmatpush3.bf16.msra.mxu1 %v6949_v43 }
 0x325   :  { %6186 = vmatprep.subr.bf16.mxu1 %v6960_v0 }
 0x327   :  { %5493 = vmatmul.mubr.f32.vlgmr.msra.gmra.mrb[0].mxu1 %v790_v26 }
 0x328   :  { %6188 = vmatpush3.bf16.msra.mxu1 %v6960_v0  ;;  %5503 = vmatprep.mubr.f32.mxu1 %v778_v34 }
 0x329   :  { %6190 = vmatprep.subr.bf16.mxu1 %v6962_v1 }
 0x32c   :  { %6192 = vmatpush3.bf16.msra.mxu1 %v6962_v1 }
 0x32d   :  { %6194 = vmatprep.subr.bf16.mxu1 %v6947_v42 }
 0x32f   :  { %5504 = vmatmul.mubr.f32.vlgmr.msra.gmra.mrb[0].mxu1 %v788_v39 }
 0x330   :  { %6196 = vmatpush3.bf16.msra.mxu1 %v6947_v42  ;;  %5514 = vmatprep.mubr.f32.mxu1 %v778_v34 }
 0x331   :  { %6198 = vmatprep.subr.bf16.mxu1 %v6949_v43 }
 0x334   :  { %6200 = vmatpush3.bf16.msra.mxu1 %v6949_v43  ;;  %v7052_v43 = vpop.permute.xlu1 %1265 }
 0x337   :  { %5515 = vmatmul.mubr.f32.vlgmr.msra.gmra.mrb[0].mxu1 %v788_v39 }
 0x338   :  { %v7071_v60 = vpop.permute.xlu1 %1267 }
 0x33c   :  { %v7085_v12 = vpop.permute.xlu1 %1269 }
 0x40a   :  { %v7044_v50 = vpop.f32.mrb[0].mxu1 }
 0x40b   :  { %v7046_v51 = vpop.f32.mrb[1].mxu1  ;;  %v1280_v56 = vmul.f32 %v7044_v50, %v7038_v47  ;;  %v1282_v61 = vmul.f32 %v7044_v50, %v7042_v49  ;;  %v1284_v11 = vmul.f32 %v7044_v50, %v7052_v43  ;;  %v1286_v15 = vmul.f32 %v7044_v50, %v7085_v12 }
 0x40c   :  { %v1279_v42 = vmul.f32 %v7036_v30, %v7046_v51  ;;  %v1281_v52 = vmul.f32 %v7040_v48, %v7046_v51  ;;  %v1237_v54 = vmul.f32 0.35355338, %v7046_v51  ;;  %v1283_v57 = vmul.f32 %v7054_v53, %v7046_v51 }
 0x40d   :  { %v1285_v62 = vmul.f32 %v7071_v60, %v7046_v51 }
 0x40e   :  { %1369 = vrot.lane.b32.xlu1 %v1279_v42, %s6775_s8  ;;  %1373 = vrot.lane.b32.xlu0 %v1281_v52, %s6775_s8  ;;  %v1386_v55 = vsel %vm659_vm3, %v1237_v54, 0  ;;  %v1238_v54 = vmul.f32 0.35355338, %v7044_v50 }
 0x40f   :  { %v7064_v58 = vand.u32 4294901760, %v1386_v55 }
 0x411   :  { %v7069_v59 = vsub.f32 %v1386_v55, %v7064_v58 }
 0x412   :  { %1371 = vrot.lane.b32.xlu1 %v1280_v56, %s6775_s8  ;;  %1377 = vrot.lane.b32.xlu0 %v1283_v57, %s6775_s8 }
 0x413   :  { %v1482_v63 = vand.u32 4294901760, %v7069_v59 }
 0x415   :  { %v1483_v0 = vsub.f32 %v7069_v59, %v1482_v63 }
 0x416   :  { %1375 = vrot.lane.b32.xlu1 %v1282_v61, %s6775_s8  ;;  %1381 = vrot.lane.b32.xlu0 %v1285_v62, %s6775_s8 }
 0x417   :  { %v1484_v1 = vand.u32 4294901760, %v1483_v0 }
 0x419   :  { %5533 = vmatprep.mubr.f32.mxu1 %v1484_v1 }
 0x41a   :  { %1379 = vrot.lane.b32.xlu1 %v1284_v11, %s6775_s8  ;;  %1287 = vrot.lane.b32.xlu0 %v6967_v2, %s6776_s23 }
 0x41e   :  { %1383 = vrot.lane.b32.xlu1 %v1286_v15, %s6775_s8  ;;  %1291 = vrot.lane.b32.xlu0 %v6985_v6, %s6776_s23 }
 0x422   :  { %1289 = vrot.lane.b32.xlu1 %v6973_v4, %s6776_s23  ;;  %1295 = vrot.lane.b32.xlu0 %v6978_v5, %s6776_s23 }
 0x426   :  { %1293 = vrot.lane.b32.xlu1 %v6991_v7, %s6776_s23  ;;  %1299 = vrot.lane.b32.xlu0 %v7003_v9, %s6776_s23 }
 0x42a   :  { %1297 = vrot.lane.b32.xlu1 %v6997_v8, %s6776_s23 }
 0x42e   :  { %1301 = vrot.lane.b32.xlu1 %v7009_v10, %s6776_s23 }
 0x480   :  { %v1374_v2 = vpop.permute.xlu0 %1373  ;;  %v1370_v6 = vpop.permute.xlu1 %1369 }
 0x481   :  { %v1391_v16 = vsel %vm659_vm3, %v1370_v6, 0  ;;  %v1395_v4 = vsel %vm659_vm3, %v1374_v2, 0  ;;  %v1389_v6 = vsel %vm659_vm3, %v1238_v54, 0 }
 0x482   :  { %v1408_v17 = vand.u32 4294901760, %v1391_v16  ;;  %v1414_v20 = vand.u32 4294901760, %v1395_v4 }
 0x484   :  { %v1378_v5 = vpop.permute.xlu0 %1377  ;;  %v1372_v19 = vpop.permute.xlu1 %1371  ;;  %v7110_v9 = vsub.f32 %v1391_v16, %v1408_v17  ;;  %v7118_v27 = vsub.f32 %v1395_v4, %v1414_v20 }
 0x485   :  { %v1393_v7 = vsel %vm659_vm3, %v1372_v19, 0  ;;  %v1399_v8 = vsel %vm659_vm3, %v1378_v5, 0 }
 0x486   :  { %v1411_v21 = vand.u32 4294901760, %v1393_v7  ;;  %v1503_v29 = vand.u32 4294901760, %v7110_v9  ;;  %v1420_v31 = vand.u32 4294901760, %v1399_v8  ;;  %v1517_v44 = vand.u32 4294901760, %v7118_v27 }
 0x488   :  { %v7113_v24 = vpack.c.bf16 %v1411_v21, %v1408_v17  ;;  %v1382_v10 = vpop.permute.xlu0 %1381  ;;  %v1376_v14 = vpop.permute.xlu1 %1375  ;;  %v7115_v23 = vsub.f32 %v1393_v7, %v1411_v21  ;;  %v7135_v26 = vsub.f32 %v1399_v8, %v1420_v31  ;;  %v7163_v7 = vand.u32 4294901760, %v1389_v6 }
 0x489   :  { %v1397_v25 = vsel %vm659_vm3, %v1376_v14, 0  ;;  %v1403_v3 = vsel %vm659_vm3, %v1382_v10, 0  ;;  %v1504_v14 = vsub.f32 %v7110_v9, %v1503_v29 }
 0x48a   :  { %v1417_v28 = vand.u32 4294901760, %v1397_v25  ;;  %6202 = vmatprep.subr.bf16.mxu1 %v7113_v24  ;;  %v1510_v32 = vand.u32 4294901760, %v7115_v23  ;;  %v1426_v39 = vand.u32 4294901760, %v1403_v3  ;;  %v1531_v0 = vand.u32 4294901760, %v7135_v26 }
 0x48b   :  { %6204 = vmatpush3.bf16.xpose.msra.mxu1 %v7113_v24 }
 0x48c   :  { %v7125_v33 = vpack.c.bf16 %v1417_v28, %v1414_v20  ;;  %v7127_v34 = vsub.f32 %v1397_v25, %v1417_v28  ;;  %v1380_v35 = vpop.permute.xlu1 %1379  ;;  %v1288_v36 = vpop.permute.xlu0 %1287  ;;  %v7130_v38 = vpack.c.bf16 %v1510_v32, %v1503_v29  ;;  %v7143_v56 = vsub.f32 %v1403_v3, %v1426_v39 }
 0x48d   :  { %v1401_v37 = vsel %vm659_vm3, %v1380_v35, 0  ;;  %v1511_v8 = vsub.f32 %v7115_v23, %v1510_v32  ;;  %v7176_v25 = vsub.f32 %v1389_v6, %v7163_v7  ;;  %v1311_v28 = vmul.f32 %v1288_v36, %v7046_v51 }
 0x48e   :  { %v1524_v40 = vand.u32 4294901760, %v7127_v34  ;;  %v1423_v41 = vand.u32 4294901760, %v1401_v37  ;;  %6206 = vmatprep.subr.bf16.mxu1 %v7125_v33  ;;  %v1545_v4 = vand.u32 4294901760, %v7143_v56  ;;  %v1505_v3 = vand.u32 4294901760, %v1504_v14 }
 0x48f   :  { %v1492_v32 = vand.u32 4294901760, %v7176_v25  ;;  %v1518_v29 = vsub.f32 %v7118_v27, %v1517_v44  ;;  %v6233_v14 = vpack.c.bf16 %v7115_v23, %v7110_v9 }
 0x490   :  { %v7137_v45 = vsub.f32 %v1401_v37, %v1423_v41  ;;  %v1384_v46 = vpop.permute.xlu1 %1383  ;;  %v1292_v42 = vpop.permute.xlu0 %1291  ;;  %v7141_v55 = vpack.c.bf16 %v1524_v40, %v1517_v44  ;;  %v7145_v57 = vpack.c.bf16 %v1423_v41, %v1420_v31  ;;  %v1512_v31 = vand.u32 4294901760, %v1511_v8 }
 0x491   :  { %v1405_v52 = vsel %vm659_vm3, %v1384_v46, 0  ;;  %v1313_v35 = vmul.f32 %v1292_v42, %v7046_v51  ;;  %v1525_v37 = vsub.f32 %v7127_v34, %v1524_v40  ;;  %v1493_v36 = vsub.f32 %v7176_v25, %v1492_v32 }
 0x492   :  { %v1538_v61 = vand.u32 4294901760, %v7137_v45  ;;  %v1429_v62 = vand.u32 4294901760, %v1405_v52  ;;  %v6217_v41 = vpack.c.bf16 %v1512_v31, %v1505_v3  ;;  %v1519_v40 = vand.u32 4294901760, %v1518_v29 }
 0x493   :  { %6208 = vmatpush3.bf16.xpose.msra.mxu1 %v7125_v33  ;;  %v1494_v42 = vand.u32 4294901760, %v1493_v36  ;;  %v1532_v44 = vsub.f32 %v7135_v26, %v1531_v0 }
 0x494   :  { %v7150_v1 = vsub.f32 %v1405_v52, %v1429_v62  ;;  %6210 = vmatprep.subr.bf16.mxu1 %v7145_v57  ;;  %v1290_v11 = vpop.permute.xlu1 %1289  ;;  %v1296_v15 = vpop.permute.xlu0 %1295  ;;  %v7155_v16 = vpack.c.bf16 %v1538_v61, %v1531_v0  ;;  %v7169_v10 = vpack.c.bf16 %v1429_v62, %v1426_v39  ;;  %v1526_v52 = vand.u32 4294901760, %v1525_v37 }
 0x495   :  { %v1312_v2 = vmul.f32 %v7044_v50, %v1290_v11  ;;  %v7160_v5 = vmul.f32 %v1296_v15, %v7046_v51  ;;  %v1539_v54 = vsub.f32 %v7137_v45, %v1538_v61  ;;  %v1533_v15 = vand.u32 4294901760, %v1532_v44 }
 0x496   :  { %v1552_v17 = vand.u32 4294901760, %v7150_v1  ;;  %v6221_v62 = vpack.c.bf16 %v1526_v52, %v1519_v40  ;;  %v6237_v0 = vpack.c.bf16 %v7127_v34, %v7118_v27 }
 0x497   :  { %1329 = vrot.lane.b32.xlu0 %v1312_v2, %s6776_s23  ;;  %v1540_v11 = vand.u32 4294901760, %v1539_v54 }
 0x498   :  { %v1294_v19 = vpop.permute.xlu1 %1293  ;;  %v7165_v20 = vpack.c.bf16 %v1552_v17, %v1545_v4  ;;  %v1553_v2 = vsub.f32 %v7150_v1, %v1552_v17  ;;  %v6245_v17 = vpack.c.bf16 %v7150_v1, %v7143_v56  ;;  %v7218_v9 = vpop.permute.xlu0 %1299 }
 0x499   :  { %v1314_v21 = vmul.f32 %v7044_v50, %v1294_v19  ;;  %v6225_v6 = vpack.c.bf16 %v1540_v11, %v1533_v15  ;;  %v1546_v19 = vsub.f32 %v7143_v56, %v1545_v4  ;;  %v6241_v4 = vpack.c.bf16 %v7137_v45, %v7135_v26 }
 0x49b   :  { %6212 = vmatpush3.bf16.xpose.msra.mxu1 %v7145_v57  ;;  %1333 = vrot.lane.b32.xlu1 %v1314_v21, %s6776_s23  ;;  %v1554_v21 = vand.u32 4294901760, %v1553_v2  ;;  %v1547_v8 = vand.u32 4294901760, %v1546_v19 }
 0x49c   :  { %6214 = vmatprep.subr.bf16.mxu1 %v7169_v10  ;;  %v1298_v39 = vpop.permute.xlu1 %1297 }
 0x49d   :  { %v1316_v46 = vmul.f32 %v7044_v50, %v1298_v39  ;;  %v6229_v61 = vpack.c.bf16 %v1554_v21, %v1547_v8 }
 0x49f   :  { %1327 = vrot.lane.b32.xlu1 %v1311_v28, %s6776_s23 }
 0x4a0   :  { %v7220_v23 = vpop.permute.xlu1 %1301 }
 0x4a3   :  { %6216 = vmatpush3.bf16.xpose.msra.mxu1 %v7169_v10  ;;  %1331 = vrot.lane.b32.xlu1 %v1313_v35, %s6776_s23 }
 0x4a4   :  { %6218 = vmatprep.subr.bf16.mxu1 %v6217_v41 }
 0x4a7   :  { %1337 = vrot.lane.b32.xlu1 %v1316_v46, %s6776_s23 }
 0x4aa   :  { %5534 = vmatmul.mubr.f32.vlgmr.msra.gmra.mrb[2].mxu1 %v1494_v42 }
 0x4ab   :  { %6220 = vmatpush3.bf16.xpose.msra.mxu1 %v6217_v41  ;;  %5552 = vmatprep.mubr.f32.mxu1 %v7064_v58 }
 0x4ac   :  { %6222 = vmatprep.subr.bf16.mxu1 %v6221_v62 }
 0x4b3   :  { %6224 = vmatpush3.bf16.xpose.msra.mxu1 %v6221_v62 }
 0x4b4   :  { %6226 = vmatprep.subr.bf16.mxu1 %v6225_v6 }
 0x4bb   :  { %6228 = vmatpush3.bf16.xpose.msra.mxu1 %v6225_v6 }
 0x4bc   :  { %6230 = vmatprep.subr.bf16.mxu1 %v6229_v61 }
 0x4c3   :  { %6232 = vmatpush3.bf16.xpose.msra.mxu1 %v6229_v61 }
 0x4c4   :  { %6234 = vmatprep.subr.bf16.mxu1 %v6233_v14 }
 0x4ca   :  { %5553 = vmatmul.mubr.f32.vlgmr.msra.gmra.mrb[2].mxu1 %v7163_v7 }
 0x4cb   :  { %6236 = vmatpush3.bf16.xpose.msra.mxu1 %v6233_v14  ;;  %5571 = vmatprep.mubr.f32.mxu1 %v7069_v59 }
 0x4cc   :  { %6238 = vmatprep.subr.bf16.mxu1 %v6237_v0 }
 0x4d3   :  { %6240 = vmatpush3.bf16.xpose.msra.mxu1 %v6237_v0 }
 0x4d4   :  { %6242 = vmatprep.subr.bf16.mxu1 %v6241_v4 }
 0x4db   :  { %6244 = vmatpush3.bf16.xpose.msra.mxu1 %v6241_v4  ;;  %v1318_v4 = vmul.f32 %v7044_v50, %v7220_v23 }
 0x4dc   :  { %6246 = vmatprep.subr.bf16.mxu1 %v6245_v17 }
 0x4e3   :  { %6248 = vmatpush3.bf16.xpose.msra.mxu1 %v6245_v17  ;;  %v1317_v17 = vmul.f32 %v7218_v9, %v7046_v51 }
 0x4e4   :  { %6250 = vmatprep.subr.bf16.mxu1 %v7113_v24 }
 0x4ea   :  { %5572 = vmatmul.mubr.f32.vlgmr.msra.gmra.mrb[2].mxu1 %v7176_v25 }
 0x4eb   :  { %6252 = vmatpush3.bf16.xpose.msra.mxu1 %v7113_v24  ;;  %5590 = vmatprep.mubr.f32.mxu1 %v1482_v63 }
 0x4ec   :  { %6254 = vmatprep.subr.bf16.mxu1 %v7125_v33 }
 0x4f3   :  { %6256 = vmatpush3.bf16.xpose.msra.mxu1 %v7125_v33 }
 0x4f4   :  { %6258 = vmatprep.subr.bf16.mxu1 %v7145_v57 }
 0x4fb   :  { %6260 = vmatpush3.bf16.xpose.msra.mxu1 %v7145_v57 }
 0x4fc   :  { %6262 = vmatprep.subr.bf16.mxu1 %v7169_v10 }
 0x503   :  { %6264 = vmatpush3.bf16.xpose.msra.mxu1 %v7169_v10 }
 0x504   :  { %6266 = vmatprep.subr.bf16.mxu1 %v7130_v38 }
 0x509   :  { %v1330_v59 = vpop.permute.xlu0 %1329 }
 0x50a   :  { %v1352_v63 = vsel %vm659_vm3, %v1330_v59, %v7038_v47  ;;  %5591 = vmatmul.mubr.f32.vlgmr.msra.gmra.mrb[2].mxu1 %v1492_v32 }
 0x50b   :  { %v2044_v27 = vand.u32 4294901760, %v1352_v63  ;;  %6268 = vmatpush3.bf16.xpose.msra.mxu1 %v7130_v38  ;;  %5609 = vmatprep.mubr.f32.mxu1 %v7064_v58 }
 0x50c   :  { %6270 = vmatprep.subr.bf16.mxu1 %v7141_v55 }
 0x50d   :  { %v2142_v34 = vsub.f32 %v1352_v63, %v2044_v27  ;;  %v1334_v26 = vpop.permute.xlu1 %1333 }
 0x50e   :  { %v1354_v45 = vsel %vm659_vm3, %v1334_v26, %v7042_v49 }
 0x50f   :  { %v2050_v56 = vand.u32 4294901760, %v1354_v45  ;;  %v2143_v31 = vand.u32 4294901760, %v2142_v34 }
 0x511   :  { %v2156_v1 = vsub.f32 %v1354_v45, %v2050_v56  ;;  %v1328_v28 = vpop.permute.xlu1 %1327  ;;  %v2144_v49 = vsub.f32 %v2142_v34, %v2143_v31 }
 0x512   :  { %v1351_v47 = vsel %vm659_vm3, %v1328_v28, %v7036_v30 }
 0x513   :  { %v2041_v25 = vand.u32 4294901760, %v1351_v47  ;;  %6272 = vmatpush3.bf16.xpose.msra.mxu1 %v7141_v55  ;;  %v2157_v37 = vand.u32 4294901760, %v2156_v1  ;;  %v2145_v52 = vand.u32 4294901760, %v2144_v49 }
 0x514   :  { %6274 = vmatprep.subr.bf16.mxu1 %v7155_v16 }
 0x515   :  { %v7235_v38 = vpack.c.bf16 %v2044_v27, %v2041_v25  ;;  %v2135_v3 = vsub.f32 %v1351_v47, %v2041_v25  ;;  %v1332_v32 = vpop.permute.xlu1 %1331  ;;  %v2158_v40 = vsub.f32 %v2156_v1, %v2157_v37 }
 0x516   :  { %v1353_v35 = vsel %vm659_vm3, %v1332_v32, %v7040_v48 }
 0x517   :  { %v2136_v39 = vand.u32 4294901760, %v2135_v3  ;;  %v2047_v41 = vand.u32 4294901760, %v1353_v35  ;;  %6298 = vmatprep.subr.bf16.mxu0 %v7235_v38  ;;  %v7240_v29 = vpack.c.bf16 %v2142_v34, %v2135_v3  ;;  %v2159_v2 = vand.u32 4294901760, %v2158_v40 }
 0x518   :  { %6300 = vmatpush3.bf16.msra.mxu0 %v7235_v38 }
 0x519   :  { %v7243_v30 = vpack.c.bf16 %v2050_v56, %v2047_v41  ;;  %v2149_v55 = vsub.f32 %v1353_v35, %v2047_v41  ;;  %v2137_v36 = vsub.f32 %v2135_v3, %v2136_v39  ;;  %v7245_v46 = vpack.c.bf16 %v2143_v31, %v2136_v39  ;;  %v1338_v59 = vpop.permute.xlu1 %1337 }
 0x51a   :  { %v1356_v49 = vsel %vm659_vm3, %v1338_v59, %v7052_v43 }
 0x51b   :  { %v2150_v42 = vand.u32 4294901760, %v2149_v55  ;;  %6276 = vmatpush3.bf16.xpose.msra.mxu1 %v7155_v16  ;;  %6302 = vmatprep.subr.bf16.mxu0 %v7243_v30  ;;  %v2138_v48 = vand.u32 4294901760, %v2137_v36  ;;  %v7249_v54 = vpack.c.bf16 %v2156_v1, %v2149_v55 }
 0x51c   :  { %6278 = vmatprep.subr.bf16.mxu1 %v7165_v20  ;;  %6304 = vmatpush3.bf16.msra.mxu0 %v7243_v30 }
 0x51d   :  { %v7253_v62 = vpack.c.bf16 %v2145_v52, %v2138_v48  ;;  %v2151_v44 = vsub.f32 %v2149_v55, %v2150_v42  ;;  %v7255_v11 = vpack.c.bf16 %v2157_v37, %v2150_v42  ;;  %v2056_v48 = vand.u32 4294901760, %v1356_v49 }
 0x51f   :  { %v2152_v15 = vand.u32 4294901760, %v2151_v44 }
 0x521   :  { %v7257_v6 = vpack.c.bf16 %v2159_v2, %v2152_v15 }
 0x523   :  { %6280 = vmatpush3.bf16.xpose.msra.mxu1 %v7165_v20 }
 0x524   :  { %6282 = vmatprep.subr.bf16.mxu1 %v7113_v24 }
 0x52a   :  { %5610 = vmatmul.mubr.f32.vlgmr.msra.gmra.mrb[2].mxu1 %v7163_v7 }
 0x52b   :  { %6284 = vmatpush3.bf16.xpose.msra.mxu1 %v7113_v24  ;;  %5628 = vmatprep.mubr.f32.mxu1 %v7064_v58  ;;  %v1360_v24 = vld [vmem:[%s7571_s9 + $0x8] sm:$0xff]  ;;  %v1359_v58 = vld [vmem:[%s7571_s9] sm:$0xff] }
 0x52c   :  { %6286 = vmatprep.subr.bf16.mxu1 %v7125_v33 }
 0x533   :  { %6288 = vmatpush3.bf16.xpose.msra.mxu1 %v7125_v33 }
 0x534   :  { %6290 = vmatprep.subr.bf16.mxu1 %v7145_v57 }
 0x53b   :  { %6292 = vmatpush3.bf16.xpose.msra.mxu1 %v7145_v57 }
 0x53c   :  { %6294 = vmatprep.subr.bf16.mxu1 %v7169_v10 }
 0x543   :  { %6296 = vmatpush3.bf16.xpose.msra.mxu1 %v7169_v10 }
 0x54a   :  { %5629 = vmatmul.mubr.f32.vlgmr.msra.gmra.mrb[2].mxu1 %v7163_v7 }
 0x61d   :  { %v5630_v16 = vpop.f32.mrb[2].mxu1 }
 0x61e   :  { %v6633_v33 = vadd.f32 %v5630_v16, %v1360_v24  ;;  %v1977_v20 = vpop.f32.mrb[3].mxu1 }
 0x61f   :  { %v6634_v57 = vadd.f32 %v1977_v20, %v1359_v58 }
 0x620   :  { %v1991_v19 = vsel %vm1987_vm4, %v6633_v33, -inf  ;;  %v2000_v7 = vsel %vm1996_vm5, %v6633_v33, -inf  ;;  %v2009_v8 = vsel %vm2005_vm6, %v6633_v33, -inf  ;;  %v2018_v14 = vsel %vm2014_vm7, %v6633_v33, -inf }
 0x621   :  { %1992 = vmax.xlane.f32.xlu0 %v1991_v19  ;;  %v1997_v10 = vsel %vm1996_vm5, %v6634_v57, -inf  ;;  %v2006_v21 = vsel %vm2005_vm6, %v6634_v57, -inf  ;;  %v2015_v61 = vsel %vm2014_vm7, %v6634_v57, -inf  ;;  %v1988_v0 = vsel %vm1987_vm4, %v6634_v57, -inf }
 0x622   :  { %1998 = vmax.xlane.f32.xlu1 %v1997_v10 }
 0x625   :  { %2001 = vmax.xlane.f32.xlu0 %v2000_v7 }
 0x626   :  { %2007 = vmax.xlane.f32.xlu1 %v2006_v21  ;;  %v2170_v21 = vsub.f32 %v1356_v49, %v2056_v48  ;;  %v2635_v49 = vld [vmem:[%s7566_s4 + $0x18] sm:$0xff] }
 0x629   :  { %2010 = vmax.xlane.f32.xlu0 %v2009_v8 }
 0x62a   :  { %2016 = vmax.xlane.f32.xlu1 %v2015_v61 }
 0x62d   :  { %2019 = vmax.xlane.f32.xlu0 %v2018_v14 }
 0x631   :  { %1989 = vmax.xlane.f32.xlu0 %v1988_v0 }
 0x63b   :  { %1341 = vrot.lane.b32.xlu1 %v1318_v4, %s6776_s23 }
 0x647   :  { %1335 = vrot.lane.b32.xlu0 %v7160_v5, %s6776_s23 }
 0x64b   :  { %1339 = vrot.lane.b32.xlu0 %v1317_v17, %s6776_s23  ;;  %v2171_v17 = vand.u32 4294901760, %v2170_v21 }
 0x6ae   :  { %v1993_v63 = vpop.xlane.xlu0 %1992 }
 0x6af   :  { %v1999_v27 = vpop.xlane.xlu1 %1998  ;;  %v1995_v28 = vsub.f32 %v6633_v33, %v1993_v63 }
 0x6b0   :  { %v2003_v3 = vsub.f32 %v6634_v57, %v1999_v27 }
 0x6b2   :  { %v2002_v34 = vpop.xlane.xlu0 %2001 }
 0x6b3   :  { %v2008_v26 = vpop.xlane.xlu1 %2007  ;;  %v2004_v56 = vsub.f32 %v6633_v33, %v2002_v34 }
 0x6b4   :  { %v2012_v35 = vsub.f32 %v6634_v57, %v2008_v26 }
 0x6b5   :  { %v2024_v23 = vsel %vm1987_vm4, %v1995_v28, %v2004_v56  ;;  %v2172_v28 = vsub.f32 %v2170_v21, %v2171_v17 }
 0x6b6   :  { %v2011_v45 = vpop.xlane.xlu0 %2010 }
 0x6b7   :  { %v2013_v1 = vsub.f32 %v6633_v33, %v2011_v45  ;;  %v2017_v47 = vpop.xlane.xlu1 %2016 }
 0x6b8   :  { %v2021_v37 = vsub.f32 %v6634_v57, %v2017_v47 }
 0x6b9   :  { %v2026_v5 = vsel %vm659_vm3, %v2024_v23, %v2013_v1 }
 0x6ba   :  { %v2020_v50 = vpop.xlane.xlu0 %2019 }
 0x6bb   :  { %v2022_v31 = vsub.f32 %v6633_v33, %v2020_v50  ;;  %v1342_v41 = vpop.permute.xlu1 %1341 }
 0x6bc   :  { %v1358_v15 = vsel %vm659_vm3, %v1342_v41, %v7085_v12 }
 0x6bd   :  { %v2029_v51 = vsel %vm2027_vm8, %v2026_v5, %v2022_v31  ;;  %v2062_v58 = vand.u32 4294901760, %v1358_v15  ;;  %v2173_v31 = vand.u32 4294901760, %v2172_v28 }
 0x6be   :  { %v2032_v9 = vmul.f32 1.442695, %v2029_v51  ;;  %v1990_v25 = vpop.xlane.xlu0 %1989 }
 0x6bf   :  { %v1994_v32 = vsub.f32 %v6634_v57, %v1990_v25  ;;  %v2184_v59 = vsub.f32 %v1358_v15, %v2062_v58 }
 0x6c0   :  { %6726 = vpow2.f32 %v2032_v9 }
 0x6c1   :  { %v2023_v39 = vsel %vm1987_vm4, %v1994_v32, %v2003_v3  ;;  %v2185_v56 = vand.u32 4294901760, %v2184_v59 }
 0x6c2   :  { %v2025_v55 = vsel %vm659_vm3, %v2023_v39, %v2012_v35  ;;  %v1336_v36 = vpop.permute.xlu0 %1335  ;;  %v2652_v39 = vand.u32 4294901760, %v2635_v49 }
 0x6c3   :  { %v2028_v52 = vsel %vm2027_vm8, %v2025_v55, %v2021_v37  ;;  %v1355_v42 = vsel %vm659_vm3, %v1336_v36, %v7054_v53  ;;  %v2186_v5 = vsub.f32 %v2184_v59, %v2185_v56 }
 0x6c4   :  { %v2030_v40 = vmul.f32 1.442695, %v2028_v52  ;;  %v2053_v44 = vand.u32 4294901760, %v1355_v42 }
 0x6c5   :  { %v2187_v9 = vand.u32 4294901760, %v2186_v5 }
 0x6c6   :  { %6728 = vpow2.f32 %v2030_v40  ;;  %v7299_v43 = vpack.c.bf16 %v2056_v48, %v2053_v44  ;;  %v1340_v2 = vpop.permute.xlu0 %1339  ;;  %v7314_v19 = vsub.f32 %v1355_v42, %v2053_v44 }
 0x6c7   :  { %v1357_v24 = vsel %vm659_vm3, %v1340_v2, %v7071_v60 }
 0x6c8   :  { %v2059_v16 = vand.u32 4294901760, %v1357_v24  ;;  %6306 = vmatprep.subr.bf16.mxu0 %v7299_v43  ;;  %v2164_v14 = vand.u32 4294901760, %v7314_v19 }
 0x6c9   :  { %6308 = vmatpush3.bf16.msra.mxu0 %v7299_v43 }
 0x6ca   :  { %v6727_v53 = vpop.eup %6726  ;;  %v7305_v33 = vpack.c.bf16 %v2062_v58, %v2059_v16  ;;  %v2177_v0 = vsub.f32 %v1357_v24, %v2059_v16  ;;  %v2165_v26 = vsub.f32 %v7314_v19, %v2164_v14 }
 0x6cb   :  { %v2038_v20 = vsel %vm71_vm0, %v6727_v53, 0 }
 0x6cc   :  { %6310 = vmatprep.subr.bf16.mxu0 %v7305_v33  ;;  %v7309_v12 = vand.u32 4294901760, %v2038_v20  ;;  %v2178_v34 = vand.u32 4294901760, %v2177_v0  ;;  %v2166_v50 = vand.u32 4294901760, %v2165_v26 }
 0x6cd   :  { %6312 = vmatpush3.bf16.msra.mxu0 %v7305_v33 }
 0x6ce   :  { %6314 = vmatprep.subr.bf16.mxu0 %v7253_v62  ;;  %v2124_v60 = vsub.f32 %v2038_v20, %v7309_v12  ;;  %v2179_v23 = vsub.f32 %v2177_v0, %v2178_v34  ;;  %v6321_v47 = vpack.c.bf16 %v2173_v31, %v2166_v50 }
 0x6d0   :  { %v6729_v57 = vpop.eup %6728  ;;  %v2125_v8 = vand.u32 4294901760, %v2124_v60  ;;  %v2180_v51 = vand.u32 4294901760, %v2179_v23 }
 0x6d1   :  { %v2035_v10 = vsel %vm71_vm0, %v6729_v57, 0 }
 0x6d2   :  { %v7317_v7 = vand.u32 4294901760, %v2035_v10  ;;  %v2126_v63 = vsub.f32 %v2124_v60, %v2125_v8  ;;  %v6325_v25 = vpack.c.bf16 %v2187_v9, %v2180_v51 }
 0x6d4   :  { %v2114_v61 = vsub.f32 %v2035_v10, %v7317_v7  ;;  %v2127_v1 = vand.u32 4294901760, %v2126_v63 }
 0x6d6   :  { %v2115_v4 = vand.u32 4294901760, %v2114_v61 }
 0x6d8   :  { %v2116_v27 = vsub.f32 %v2114_v61, %v2115_v4 }
 0x6da   :  { %v2117_v45 = vand.u32 4294901760, %v2116_v27 }
 0x6dc   :  { %5647 = vmatprep.mubr.f32.mxu0 %v2117_v45 }
 0x6dd   :  { %5648 = vmatmul.mubr.f32.vlgmr.msra.gmra.mrb[2].mxu0 %v2127_v1 }
 0x6de   :  { %6316 = vmatpush3.bf16.msra.mxu0 %v7253_v62  ;;  %5666 = vmatprep.mubr.f32.mxu0 %v7317_v7  ;;  %v6337_v62 = vpack.c.bf16 %v2170_v21, %v7314_v19 }
 0x6df   :  { %6318 = vmatprep.subr.bf16.mxu0 %v7257_v6 }
 0x6e2   :  { %6320 = vmatpush3.bf16.msra.mxu0 %v7257_v6  ;;  %v6341_v6 = vpack.c.bf16 %v2184_v59, %v2177_v0 }
 0x6e3   :  { %6322 = vmatprep.subr.bf16.mxu0 %v6321_v47 }
 0x6e6   :  { %6324 = vmatpush3.bf16.msra.mxu0 %v6321_v47 }
 0x6e7   :  { %6326 = vmatprep.subr.bf16.mxu0 %v6325_v25 }
 0x6ea   :  { %6328 = vmatpush3.bf16.msra.mxu0 %v6325_v25 }
 0x6eb   :  { %6330 = vmatprep.subr.bf16.mxu0 %v7240_v29 }
 0x6ed   :  { %5667 = vmatmul.mubr.f32.vlgmr.msra.gmra.mrb[2].mxu0 %v7309_v12 }
 0x6ee   :  { %6332 = vmatpush3.bf16.msra.mxu0 %v7240_v29  ;;  %5685 = vmatprep.mubr.f32.mxu0 %v2114_v61  ;;  %v6369_v29 = vpack.c.bf16 %v2171_v17, %v2164_v14 }
 0x6ef   :  { %6334 = vmatprep.subr.bf16.mxu0 %v7249_v54 }
 0x6f2   :  { %6336 = vmatpush3.bf16.msra.mxu0 %v7249_v54  ;;  %v6373_v54 = vpack.c.bf16 %v2185_v56, %v2178_v34 }
 0x6f3   :  { %6338 = vmatprep.subr.bf16.mxu0 %v6337_v62 }
 0x6f6   :  { %6340 = vmatpush3.bf16.msra.mxu0 %v6337_v62 }
 0x6f7   :  { %6342 = vmatprep.subr.bf16.mxu0 %v6341_v6 }
 0x6fa   :  { %6344 = vmatpush3.bf16.msra.mxu0 %v6341_v6 }
 0x6fb   :  { %6346 = vmatprep.subr.bf16.mxu0 %v7235_v38 }
 0x6fd   :  { %5686 = vmatmul.mubr.f32.vlgmr.msra.gmra.mrb[2].mxu0 %v2124_v60 }
 0x6fe   :  { %6348 = vmatpush3.bf16.msra.mxu0 %v7235_v38  ;;  %5704 = vmatprep.mubr.f32.mxu0 %v2115_v4 }
 0x6ff   :  { %6350 = vmatprep.subr.bf16.mxu0 %v7243_v30 }
 0x702   :  { %6352 = vmatpush3.bf16.msra.mxu0 %v7243_v30 }
 0x703   :  { %6354 = vmatprep.subr.bf16.mxu0 %v7299_v43 }
 0x706   :  { %6356 = vmatpush3.bf16.msra.mxu0 %v7299_v43 }
 0x707   :  { %6358 = vmatprep.subr.bf16.mxu0 %v7305_v33 }
 0x70a   :  { %6360 = vmatpush3.bf16.msra.mxu0 %v7305_v33 }
 0x70b   :  { %6362 = vmatprep.subr.bf16.mxu0 %v7245_v46 }
 0x70d   :  { %5705 = vmatmul.mubr.f32.vlgmr.msra.gmra.mrb[2].mxu0 %v2125_v8 }
 0x70e   :  { %6364 = vmatpush3.bf16.msra.mxu0 %v7245_v46  ;;  %5723 = vmatprep.mubr.f32.mxu0 %v7317_v7 }
 0x70f   :  { %6366 = vmatprep.subr.bf16.mxu0 %v7255_v11 }
 0x712   :  { %6368 = vmatpush3.bf16.msra.mxu0 %v7255_v11  ;;  %v2633_v11 = vld [vmem:[%s7566_s4 + $0x8] sm:$0xff] }
 0x713   :  { %6370 = vmatprep.subr.bf16.mxu0 %v6369_v29  ;;  %v2646_v35 = vand.u32 4294901760, %v2633_v11 }
 0x715   :  { %v2740_v52 = vsub.f32 %v2633_v11, %v2646_v35 }
 0x716   :  { %6372 = vmatpush3.bf16.msra.mxu0 %v6369_v29 }
 0x717   :  { %6374 = vmatprep.subr.bf16.mxu0 %v6373_v54  ;;  %v2741_v48 = vand.u32 4294901760, %v2740_v52 }
 0x719   :  { %v2742_v44 = vsub.f32 %v2740_v52, %v2741_v48 }
 0x71a   :  { %6376 = vmatpush3.bf16.msra.mxu0 %v6373_v54 }
 0x71b   :  { %6378 = vmatprep.subr.bf16.mxu0 %v7235_v38  ;;  %v2743_v24 = vand.u32 4294901760, %v2742_v44 }
 0x71d   :  { %5724 = vmatmul.mubr.f32.vlgmr.msra.gmra.mrb[2].mxu0 %v7309_v12 }
 0x71e   :  { %6380 = vmatpush3.bf16.msra.mxu0 %v7235_v38  ;;  %5742 = vmatprep.mubr.f32.mxu0 %v7317_v7  ;;  %v2632_v38 = vld [vmem:[%s7566_s4] sm:$0xff] }
 0x71f   :  { %6382 = vmatprep.subr.bf16.mxu0 %v7243_v30  ;;  %v2643_v32 = vand.u32 4294901760, %v2632_v38 }
 0x721   :  { %v7370_v41 = vpack.c.bf16 %v2646_v35, %v2643_v32  ;;  %v2733_v36 = vsub.f32 %v2632_v38, %v2643_v32  ;;  %v3210_v32 = vld [vmem:[%s7567_s5] sm:$0xff]  ;;  %v3211_v35 = vld [vmem:[%s7567_s5 + $0x8] sm:$0xff] }
 0x722   :  { %6384 = vmatpush3.bf16.msra.mxu0 %v7243_v30  ;;  %v2634_v30 = vld [vmem:[%s7566_s4 + $0x10] sm:$0xff] }
 0x723   :  { %6386 = vmatprep.subr.bf16.mxu0 %v7299_v43  ;;  %v2649_v37 = vand.u32 4294901760, %v2634_v30  ;;  %v2734_v42 = vand.u32 4294901760, %v2733_v36  ;;  %v6409_v19 = vpack.c.bf16 %v2740_v52, %v2733_v36 }
 0x725   :  { %v7372_v55 = vpack.c.bf16 %v2652_v39, %v2649_v37  ;;  %v2735_v40 = vsub.f32 %v2733_v36, %v2734_v42  ;;  %v2747_v15 = vsub.f32 %v2634_v30, %v2649_v37  ;;  %v6425_v7 = vpack.c.bf16 %v2741_v48, %v2734_v42 }
 0x726   :  { %6388 = vmatpush3.bf16.msra.mxu0 %v7299_v43  ;;  %v2754_v43 = vsub.f32 %v2635_v49, %v2652_v39  ;;  %v3212_v49 = vld [vmem:[%s7567_s5 + $0x10] sm:$0xff]  ;;  %v3221_v37 = vand.u32 4294901760, %v3210_v32  ;;  %v3224_v39 = vand.u32 4294901760, %v3211_v35 }
 0x727   :  { %6390 = vmatprep.subr.bf16.mxu0 %v7305_v33  ;;  %v2736_v2 = vand.u32 4294901760, %v2735_v40  ;;  %v2748_v58 = vand.u32 4294901760, %v2747_v15 }
 0x728   :  { %v2755_v16 = vand.u32 4294901760, %v2754_v43  ;;  %v6413_v10 = vpack.c.bf16 %v2754_v43, %v2747_v15  ;;  %v7414_v52 = vpack.c.bf16 %v3224_v39, %v3221_v37  ;;  %v3311_v48 = vsub.f32 %v3210_v32, %v3221_v37  ;;  %v3767_v37 = vld [vmem:[%s7568_s6 + $0x8] sm:$0xff] }
 0x729   :  { %v6401_v53 = vpack.c.bf16 %v2743_v24, %v2736_v2  ;;  %v3318_v40 = vsub.f32 %v3211_v35, %v3224_v39 }
 0x72a   :  { %6392 = vmatpush3.bf16.msra.mxu0 %v7305_v33  ;;  %v2749_v33 = vsub.f32 %v2747_v15, %v2748_v58  ;;  %v2756_v20 = vsub.f32 %v2754_v43, %v2755_v16  ;;  %v6429_v21 = vpack.c.bf16 %v2755_v16, %v2748_v58  ;;  %v3312_v44 = vand.u32 4294901760, %v3311_v48 }
 0x72b   :  { %6394 = vmatprep.subr.bf16.mxu0 %v7370_v41  ;;  %v3319_v15 = vand.u32 4294901760, %v3318_v40 }
 0x72c   :  { %v2757_v60 = vand.u32 4294901760, %v2756_v20  ;;  %v3313_v43 = vsub.f32 %v3311_v48, %v3312_v44 }
 0x72d   :  { %5743 = vmatmul.mubr.f32.vlgmr.msra.gmra.mrb[2].mxu0 %v7309_v12  ;;  %v2750_v12 = vand.u32 4294901760, %v2749_v33  ;;  %v3320_v2 = vsub.f32 %v3318_v40, %v3319_v15 }
 0x72e   :  { %6396 = vmatpush3.bf16.msra.mxu0 %v7370_v41  ;;  %v3314_v16 = vand.u32 4294901760, %v3313_v43 }
 0x72f   :  { %6398 = vmatprep.subr.bf16.mxu0 %v7372_v55  ;;  %v6405_v57 = vpack.c.bf16 %v2757_v60, %v2750_v12 }
 0x732   :  { %6400 = vmatpush3.bf16.msra.mxu0 %v7372_v55 }
 0x733   :  { %6402 = vmatprep.subr.bf16.mxu0 %v6401_v53 }
 0x800   :  { %v5744_v46 = vpop.f32.mrb[2].mxu0 }
 0x801   :  { %2624 = vrot.lane.b32.xlu1 %v5744_v46, %s6775_s8  ;;  %v2610_v3 = vpop.f32.mrb[3].mxu0 }
 0x802   :  { %2622 = vrot.lane.b32.xlu0 %v2610_v3, %s6775_s8 }
 0x873   :  { %v2625_v8 = vpop.permute.xlu1 %2624 }
 0x874   :  { %6730 = vrcp.f32 %v2625_v8  ;;  %v2623_v61 = vpop.permute.xlu0 %2622 }
 0x875   :  { %6732 = vrcp.f32 %v2623_v61  ;;  %v6473_v61 = vpack.c.bf16 %v3319_v15, %v3312_v44  ;;  %v3770_v44 = vld [vmem:[%s7568_s6 + $0x20] sm:$0xff]  ;;  %v3771_v15 = vld [vmem:[%s7568_s6 + $0x28] sm:$0xff] }
 0x876   :  { %v3793_v43 = vand.u32 4294901760, %v3770_v44 }
 0x87e   :  { %v6731_v14 = vpop.eup %6730 }
 0x87f   :  { %v6733_v0 = vpop.eup %6732  ;;  %v2631_v4 = vmul.f32 %v6731_v14, %v5744_v46 }
 0x880   :  { %v2629_v17 = vmul.f32 %v6733_v0, %v2610_v3 }
 0x881   :  { %v2640_v59 = vsel %vm659_vm3, %v2631_v4, 0 }
 0x882   :  { %v2637_v63 = vsel %vm659_vm3, %v2629_v17, 0  ;;  %v2721_v27 = vand.u32 4294901760, %v2640_v59 }
 0x883   :  { %v2711_v34 = vand.u32 4294901760, %v2637_v63 }
 0x884   :  { %v2722_v26 = vsub.f32 %v2640_v59, %v2721_v27 }
 0x885   :  { %v2712_v45 = vsub.f32 %v2637_v63, %v2711_v34 }
 0x886   :  { %v2723_v56 = vand.u32 4294901760, %v2722_v26 }
 0x887   :  { %v2713_v1 = vand.u32 4294901760, %v2712_v45 }
 0x888   :  { %v2724_v28 = vsub.f32 %v2722_v26, %v2723_v56 }
 0x889   :  { %v2714_v50 = vsub.f32 %v2712_v45, %v2713_v1 }
 0x88a   :  { %v2725_v31 = vand.u32 4294901760, %v2724_v28 }
 0x88b   :  { %v2715_v23 = vand.u32 4294901760, %v2714_v50 }
 0x88d   :  { %5753 = vmatprep.mubr.f32.mxu0 %v2715_v23 }
 0x88e   :  { %5754 = vmatmul.mubr.f32.vlgmr.msra.gmra.mrb[4].mxu0 %v2725_v31 }
 0x88f   :  { %6404 = vmatpush3.bf16.msra.mxu0 %v6401_v53  ;;  %5764 = vmatprep.mubr.f32.mxu0 %v2711_v34  ;;  %v3321_v53 = vand.u32 4294901760, %v3320_v2  ;;  %v3796_v2 = vand.u32 4294901760, %v3771_v15 }
 0x890   :  { %6406 = vmatprep.subr.bf16.mxu0 %v6405_v57 }
 0x891   :  { %v6449_v12 = vpack.c.bf16 %v3321_v53, %v3314_v16 }
 0x893   :  { %6408 = vmatpush3.bf16.msra.mxu0 %v6405_v57 }
 0x894   :  { %6410 = vmatprep.subr.bf16.mxu0 %v6409_v19 }
 0x896   :  { %5765 = vmatmul.mubr.f32.vlgmr.msra.gmra.mrb[4].mxu0 %v2721_v27 }
 0x897   :  { %6412 = vmatpush3.bf16.msra.mxu0 %v6409_v19  ;;  %5775 = vmatprep.mubr.f32.mxu0 %v2712_v45  ;;  %v7424_v45 = vld [vmem:[#allocation2] sm:$0xff] }
 0x898   :  { %6414 = vmatprep.subr.bf16.mxu0 %v6413_v10 }
 0x89b   :  { %6416 = vmatpush3.bf16.msra.mxu0 %v6413_v10 }
 0x89c   :  { %6418 = vmatprep.subr.bf16.mxu0 %v7370_v41 }
 0x89e   :  { %5776 = vmatmul.mubr.f32.vlgmr.msra.gmra.mrb[4].mxu0 %v2722_v26  ;;  %v3206_v26 = vsub.s32 3, %v7013_v18 }
 0x89f   :  { %6420 = vmatpush3.bf16.msra.mxu0 %v7370_v41  ;;  %5786 = vmatprep.mubr.f32.mxu0 %v2713_v1 }
 0x8a0   :  { %6422 = vmatprep.subr.bf16.mxu0 %v7372_v55  ;;  %v3207_v50 = vrot.slane %v7424_v45, %v3206_v26 }
 0x8a3   :  { %6424 = vmatpush3.bf16.msra.mxu0 %v7372_v55 }
 0x8a4   :  { %6426 = vmatprep.subr.bf16.mxu0 %v6425_v7 }
 0x8a6   :  { %5787 = vmatmul.mubr.f32.vlgmr.msra.gmra.mrb[4].mxu0 %v2723_v56 }
 0x8a7   :  { %6428 = vmatpush3.bf16.msra.mxu0 %v6425_v7  ;;  %5797 = vmatprep.mubr.f32.mxu0 %v2711_v34 }
 0x8a8   :  { %6430 = vmatprep.subr.bf16.mxu0 %v6429_v21 }
 0x8ab   :  { %6432 = vmatpush3.bf16.msra.mxu0 %v6429_v21  ;;  %v6457_v21 = vpack.c.bf16 %v3318_v40, %v3311_v48 }
 0x8ac   :  { %6434 = vmatprep.subr.bf16.mxu0 %v7370_v41 }
 0x8ae   :  { %5798 = vmatmul.mubr.f32.vlgmr.msra.gmra.mrb[4].mxu0 %v2721_v27 }
 0x8af   :  { %6436 = vmatpush3.bf16.msra.mxu0 %v7370_v41  ;;  %5808 = vmatprep.mubr.f32.mxu0 %v2711_v34  ;;  %v3213_v41 = vld [vmem:[%s7567_s5 + $0x18] sm:$0xff]  ;;  %v3200_v34 = vsub.s32 2, %v7013_v18 }
 0x8b0   :  { %6438 = vmatprep.subr.bf16.mxu0 %v7372_v55  ;;  %v3230_v36 = vand.u32 4294901760, %v3213_v41 }
 0x8b1   :  { %v3201_v56 = vrot.slane %v7424_v45, %v3200_v34  ;;  %v3910_v34 = vsub.f32 %v3771_v15, %v3796_v2 }
 0x8b2   :  { %v3332_v58 = vsub.f32 %v3213_v41, %v3230_v36  ;;  %v3784_v41 = vand.u32 4294901760, %v3767_v37 }
 0x8b3   :  { %6440 = vmatpush3.bf16.msra.mxu0 %v7372_v55  ;;  %v3227_v55 = vand.u32 4294901760, %v3212_v49 }
 0x8b4   :  { %6442 = vmatprep.subr.bf16.mxu0 %v7414_v52  ;;  %v3333_v20 = vand.u32 4294901760, %v3332_v58 }
 0x8b5   :  { %v7416_v42 = vpack.c.bf16 %v3230_v36, %v3227_v55  ;;  %v3325_v24 = vsub.f32 %v3212_v49, %v3227_v55  ;;  %v3768_v36 = vld [vmem:[%s7568_s6 + $0x10] sm:$0xff] }
 0x8b6   :  { %5809 = vmatmul.mubr.f32.vlgmr.msra.gmra.mrb[4].mxu0 %v2721_v27  ;;  %v3334_v57 = vsub.f32 %v3332_v58, %v3333_v20 }
 0x8b7   :  { %6444 = vmatpush3.bf16.msra.mxu0 %v7414_v52  ;;  %v3326_v33 = vand.u32 4294901760, %v3325_v24  ;;  %v6461_v8 = vpack.c.bf16 %v3332_v58, %v3325_v24  ;;  %v3773_v58 = vld [vmem:[%s7568_s6 + $0x38] sm:$0xff] }
 0x8b8   :  { %6446 = vmatprep.subr.bf16.mxu0 %v7416_v42  ;;  %v3335_v10 = vand.u32 4294901760, %v3334_v57  ;;  %v3802_v53 = vand.u32 4294901760, %v3773_v58 }
 0x8b9   :  { %v3327_v60 = vsub.f32 %v3325_v24, %v3326_v33  ;;  %v6477_v14 = vpack.c.bf16 %v3333_v20, %v3326_v33  ;;  %v3772_v24 = vld [vmem:[%s7568_s6 + $0x30] sm:$0xff]  ;;  %v7470_v33 = vpack.c.bf16 %v3796_v2, %v3793_v43 }
 0x8ba   :  { %v3799_v16 = vand.u32 4294901760, %v3772_v24 }
 0x8bb   :  { %6448 = vmatpush3.bf16.msra.mxu0 %v7416_v42  ;;  %v3328_v19 = vand.u32 4294901760, %v3327_v60 }
 0x8bc   :  { %6450 = vmatprep.subr.bf16.mxu0 %v6449_v12  ;;  %v7472_v60 = vpack.c.bf16 %v3802_v53, %v3799_v16 }
 0x8bd   :  { %v6453_v7 = vpack.c.bf16 %v3335_v10, %v3328_v19 }
 0x989   :  { %v5810_v5 = vpop.f32.mrb[4].mxu0 }
 0x98a   :  { %v7389_v47 = vadd.f32 %v5810_v5, %v6915_v22  ;;  %v3160_v51 = vpop.f32.mrb[5].mxu0 }
 0x98b   :  { %v7392_v9 = vadd.f32 %v3160_v51, %v6917_v13 }
 0x98c   :  { %v3175_v25 = vsel %vm659_vm3, %v7389_v47, 0.0 }
 0x98d   :  { %3176 = vadd.xlane.f32.xlu1 %v3175_v25  ;;  %v3172_v62 = vsel %vm659_vm3, %v7392_v9, 0.0 }
 0x98e   :  { %3173 = vadd.xlane.f32.xlu0 %v3172_v62 }
 0xa1a   :  { %v3177_v6 = vpop.xlane.xlu1 %3176 }
 0xa1b   :  { %v3179_v29 = vmul.f32 0.03125, %v3177_v6  ;;  %v3174_v54 = vpop.xlane.xlu0 %3173 }
 0xa1c   :  { %v3178_v46 = vmul.f32 0.03125, %v3174_v54 }
 0xa1d   :  { %v3181_v38 = vsub.f32 %v7389_v47, %v3179_v29 }
 0xa1e   :  { %v3180_v22 = vsub.f32 %v7392_v9, %v3178_v46 }
 0xa1f   :  { %v3183_v30 = vmul.f32 %v3181_v38, %v3181_v38 }
 0xa20   :  { %v3182_v11 = vmul.f32 %v3180_v22, %v3180_v22 }
 0xa21   :  { %v3187_v3 = vsel %vm659_vm3, %v3183_v30, 0.0 }
 0xa22   :  { %v3184_v13 = vsel %vm659_vm3, %v3182_v11, 0.0 }
 0xa23   :  { %3185 = vadd.xlane.f32.xlu0 %v3184_v13 }
 0xa27   :  { %3188 = vadd.xlane.f32.xlu0 %v3187_v3 }
 0xab0   :  { %v3186_v0 = vpop.xlane.xlu0 %3185 }
 0xab1   :  { %v3190_v4 = vmul.f32 0.03125, %v3186_v0 }
 0xab3   :  { %v3192_v17 = vadd.f32 1e-05, %v3190_v4 }
 0xab4   :  { %v3189_v59 = vpop.xlane.xlu0 %3188 }
 0xab5   :  { %6734 = vrsqrt.f32 %v3192_v17  ;;  %v3191_v63 = vmul.f32 0.03125, %v3189_v59 }
 0xab7   :  { %v3193_v27 = vadd.f32 1e-05, %v3191_v63 }
 0xab9   :  { %6736 = vrsqrt.f32 %v3193_v27  ;;  %v3903_v27 = vsub.f32 %v3770_v44, %v3793_v43 }
 0xabf   :  { %v6735_v1 = vpop.eup %6734 }
 0xac0   :  { %v3196_v28 = vmul.f32 %v6735_v1, %v3180_v22  ;;  %v3904_v1 = vand.u32 4294901760, %v3903_v27 }
 0xac2   :  { %v3202_v23 = vmul.f32 %v3201_v56, %v3196_v28  ;;  %v3911_v28 = vand.u32 4294901760, %v3910_v34 }
 0xac3   :  { %v6737_v31 = vpop.eup %6736 }
 0xac4   :  { %v3197_v5 = vmul.f32 %v6737_v31, %v3181_v38  ;;  %v3208_v51 = vadd.f32 %v3207_v50, %v3202_v23  ;;  %v3766_v38 = vld [vmem:[%s7568_s6] sm:$0xff]  ;;  %v3905_v23 = vsub.f32 %v3903_v27, %v3904_v1  ;;  %v3917_v31 = vsub.f32 %v3772_v24, %v3799_v16 }
 0xac5   :  { %v3781_v39 = vand.u32 4294901760, %v3766_v38 }
 0xac6   :  { %v3203_v25 = vmul.f32 %v3201_v56, %v3197_v5  ;;  %v3215_v62 = vsel %vm659_vm3, %v3208_v51, 0  ;;  %v3924_v5 = vsub.f32 %v3773_v58, %v3802_v53  ;;  %v3912_v51 = vsub.f32 %v3910_v34, %v3911_v28 }
 0xac7   :  { %v3289_v6 = vand.u32 4294901760, %v3215_v62  ;;  %v7444_v55 = vpack.c.bf16 %v3784_v41, %v3781_v39  ;;  %v3875_v20 = vsub.f32 %v3766_v38, %v3781_v39  ;;  %v7485_v39 = vpack.c.bf16 %v3911_v28, %v3904_v1 }
 0xac8   :  { %v3209_v29 = vadd.f32 %v3207_v50, %v3203_v25  ;;  %v3906_v25 = vand.u32 4294901760, %v3905_v23 }
 0xac9   :  { %v3290_v54 = vsub.f32 %v3215_v62, %v3289_v6  ;;  %6490 = vmatprep.subr.bf16.mxu1 %v7444_v55  ;;  %v3876_v57 = vand.u32 4294901760, %v3875_v20  ;;  %v3918_v62 = vand.u32 4294901760, %v3917_v31 }
 0xaca   :  { %v3218_v46 = vsel %vm659_vm3, %v3209_v29, 0  ;;  %6492 = vmatpush3.bf16.msra.mxu1 %v7444_v55  ;;  %v3913_v29 = vand.u32 4294901760, %v3912_v51 }
 0xacb   :  { %v3291_v11 = vand.u32 4294901760, %v3290_v54  ;;  %v3299_v13 = vand.u32 4294901760, %v3218_v46  ;;  %v3877_v10 = vsub.f32 %v3875_v20, %v3876_v57 }
 0xacd   :  { %v3292_v30 = vsub.f32 %v3290_v54, %v3291_v11  ;;  %v3300_v3 = vsub.f32 %v3218_v46, %v3299_v13 }
 0xacf   :  { %v3293_v32 = vand.u32 4294901760, %v3292_v30  ;;  %v3301_v22 = vand.u32 4294901760, %v3300_v3 }
 0xad1   :  { %5819 = vmatprep.mubr.f32.mxu0 %v3293_v32  ;;  %v3302_v35 = vsub.f32 %v3300_v3, %v3301_v22 }
 0xad3   :  { %v3303_v49 = vand.u32 4294901760, %v3302_v35  ;;  %v6529_v35 = vpack.c.bf16 %v3910_v34, %v3903_v27 }
 0xad5   :  { %5820 = vmatmul.mubr.f32.vlgmr.msra.gmra.mrb[6].mxu0 %v3303_v49  ;;  %v6533_v49 = vpack.c.bf16 %v3924_v5, %v3917_v31 }
 0xad6   :  { %6452 = vmatpush3.bf16.msra.mxu0 %v6449_v12  ;;  %5830 = vmatprep.mubr.f32.mxu0 %v3289_v6  ;;  %v3882_v12 = vsub.f32 %v3767_v37, %v3784_v41 }
 0xad7   :  { %6454 = vmatprep.subr.bf16.mxu0 %v6453_v7 }
 0xad8   :  { %v3883_v19 = vand.u32 4294901760, %v3882_v12  ;;  %v6521_v32 = vpack.c.bf16 %v3882_v12, %v3875_v20 }
 0xada   :  { %6456 = vmatpush3.bf16.msra.mxu0 %v6453_v7  ;;  %v3884_v7 = vsub.f32 %v3882_v12, %v3883_v19  ;;  %v7481_v38 = vpack.c.bf16 %v3883_v19, %v3876_v57 }
 0xadb   :  { %6458 = vmatprep.subr.bf16.mxu0 %v6457_v21 }
 0xadd   :  { %5831 = vmatmul.mubr.f32.vlgmr.msra.gmra.mrb[6].mxu0 %v3299_v13 }
 0xade   :  { %6460 = vmatpush3.bf16.msra.mxu0 %v6457_v21  ;;  %5841 = vmatprep.mubr.f32.mxu0 %v3290_v54  ;;  %v3919_v54 = vsub.f32 %v3917_v31, %v3918_v62 }
 0xadf   :  { %6462 = vmatprep.subr.bf16.mxu0 %v6461_v8 }
 0xae2   :  { %6464 = vmatpush3.bf16.msra.mxu0 %v6461_v8 }
 0xae3   :  { %6466 = vmatprep.subr.bf16.mxu0 %v7414_v52 }
 0xae5   :  { %5842 = vmatmul.mubr.f32.vlgmr.msra.gmra.mrb[6].mxu0 %v3300_v3 }
 0xae6   :  { %6468 = vmatpush3.bf16.msra.mxu0 %v7414_v52  ;;  %5852 = vmatprep.mubr.f32.mxu0 %v3291_v11  ;;  %v6513_v11 = vpack.c.bf16 %v3913_v29, %v3906_v25 }
 0xae7   :  { %6470 = vmatprep.subr.bf16.mxu0 %v7416_v42 }
 0xaea   :  { %6472 = vmatpush3.bf16.msra.mxu0 %v7416_v42 }
 0xaeb   :  { %6474 = vmatprep.subr.bf16.mxu0 %v6473_v61 }
 0xaed   :  { %5853 = vmatmul.mubr.f32.vlgmr.msra.gmra.mrb[6].mxu0 %v3301_v22 }
 0xaee   :  { %6476 = vmatpush3.bf16.msra.mxu0 %v6473_v61  ;;  %5863 = vmatprep.mubr.f32.mxu0 %v3289_v6  ;;  %v3878_v61 = vand.u32 4294901760, %v3877_v10 }
 0xaef   :  { %6478 = vmatprep.subr.bf16.mxu0 %v6477_v14 }
 0xaf2   :  { %6480 = vmatpush3.bf16.msra.mxu0 %v6477_v14  ;;  %v3885_v14 = vand.u32 4294901760, %v3884_v7 }
 0xaf3   :  { %6482 = vmatprep.subr.bf16.mxu0 %v7414_v52 }
 0xaf4   :  { %v7478_v17 = vpack.c.bf16 %v3885_v14, %v3878_v61 }
 0xaf5   :  { %5864 = vmatmul.mubr.f32.vlgmr.msra.gmra.mrb[6].mxu0 %v3299_v13 }
 0xaf6   :  { %6484 = vmatpush3.bf16.msra.mxu0 %v7414_v52  ;;  %5874 = vmatprep.mubr.f32.mxu0 %v3289_v6  ;;  %v3769_v52 = vld [vmem:[%s7568_s6 + $0x18] sm:$0xff]  ;;  %v3925_v6 = vand.u32 4294901760, %v3924_v5 }
 0xaf7   :  { %6486 = vmatprep.subr.bf16.mxu0 %v7416_v42  ;;  %v3790_v48 = vand.u32 4294901760, %v3769_v52 }
 0xaf8   :  { %v3926_v46 = vsub.f32 %v3924_v5, %v3925_v6  ;;  %v7487_v41 = vpack.c.bf16 %v3925_v6, %v3918_v62 }
 0xaf9   :  { %v3896_v8 = vsub.f32 %v3769_v52, %v3790_v48 }
 0xafa   :  { %6488 = vmatpush3.bf16.msra.mxu0 %v7416_v42  ;;  %v3787_v42 = vand.u32 4294901760, %v3768_v36  ;;  %v3927_v30 = vand.u32 4294901760, %v3926_v46  ;;  %v4401_v46 = vld [vmem:[%s7569_s7 + $0x8] sm:$0xff] }
 0xafb   :  { %v3897_v4 = vand.u32 4294901760, %v3896_v8 }
 0xafc   :  { %v7454_v40 = vpack.c.bf16 %v3790_v48, %v3787_v42  ;;  %v3889_v21 = vsub.f32 %v3768_v36, %v3787_v42 }
 0xafd   :  { %5875 = vmatmul.mubr.f32.vlgmr.msra.gmra.mrb[6].mxu0 %v3299_v13  ;;  %v3898_v63 = vsub.f32 %v3896_v8, %v3897_v4  ;;  %v3920_v13 = vand.u32 4294901760, %v3919_v54 }
 0xafe   :  { %6494 = vmatprep.subr.bf16.mxu1 %v7454_v40  ;;  %v3890_v0 = vand.u32 4294901760, %v3889_v21  ;;  %v6525_v22 = vpack.c.bf16 %v3896_v8, %v3889_v21 }
 0xaff   :  { %6496 = vmatpush3.bf16.msra.mxu1 %v7454_v40  ;;  %v3899_v56 = vand.u32 4294901760, %v3898_v63  ;;  %v6517_v3 = vpack.c.bf16 %v3927_v30, %v3920_v13  ;;  %v4414_v30 = vand.u32 4294901760, %v4401_v46 }
 0xb00   :  { %6498 = vmatprep.subr.bf16.mxu1 %v7470_v33  ;;  %v3891_v59 = vsub.f32 %v3889_v21, %v3890_v0  ;;  %v7483_v37 = vpack.c.bf16 %v3897_v4, %v3890_v0 }
 0xb02   :  { %v3892_v26 = vand.u32 4294901760, %v3891_v59 }
 0xb03   :  { %6500 = vmatpush3.bf16.msra.mxu1 %v7470_v33 }
 0xb04   :  { %6502 = vmatprep.subr.bf16.mxu1 %v7472_v60  ;;  %v6509_v50 = vpack.c.bf16 %v3899_v56, %v3892_v26 }
 0xb07   :  { %6504 = vmatpush3.bf16.msra.mxu1 %v7472_v60 }
 0xb08   :  { %6506 = vmatprep.subr.bf16.mxu1 %v7478_v17 }
 0xbd0   :  { %v5876_v36 = vpop.f32.mrb[6].mxu0 }
 0xbd1   :  { %v3751_v52 = vmul.f32 0.044715, %v5876_v36  ;;  %v3738_v42 = vpop.f32.mrb[7].mxu0  ;;  %v3749_v57 = vmul.f32 0.5, %v5876_v36 }
 0xbd2   :  { %v3750_v48 = vmul.f32 0.044715, %v3738_v42  ;;  %v3748_v10 = vmul.f32 0.5, %v3738_v42 }
 0xbd3   :  { %v3753_v44 = vmul.f32 %v5876_v36, %v3751_v52 }
 0xbd4   :  { %v3752_v15 = vmul.f32 %v3750_v48, %v3738_v42 }
 0xbd5   :  { %v3755_v43 = vmul.f32 %v5876_v36, %v3753_v44 }
 0xbd6   :  { %v3754_v2 = vmul.f32 %v3752_v15, %v3738_v42 }
 0xbd7   :  { %v3757_v24 = vadd.f32 %v5876_v36, %v3755_v43 }
 0xbd8   :  { %v3756_v58 = vadd.f32 %v3754_v2, %v3738_v42 }
 0xbd9   :  { %v3759_v16 = vmul.f32 0.7978846, %v3757_v24 }
 0xbda   :  { %v3758_v53 = vmul.f32 0.7978846, %v3756_v58 }
 0xbdb   :  { %6738 = vtanh.f32 %v3759_v16 }
 0xbdc   :  { %6740 = vtanh.f32 %v3758_v53 }
 0xbe5   :  { %v6739_v20 = vpop.eup %6738 }
 0xbe6   :  { %v6741_v12 = vpop.eup %6740  ;;  %v3763_v19 = vadd.f32 1.0, %v6739_v20 }
 0xbe7   :  { %v3762_v7 = vadd.f32 1.0, %v6741_v12 }
 0xbe8   :  { %v3765_v21 = vmul.f32 %v3763_v19, %v3749_v57 }
 0xbe9   :  { %v3764_v8 = vmul.f32 %v3762_v7, %v3748_v10 }
 0xbea   :  { %v3778_v61 = vsel %vm71_vm0, %v3765_v21, 0 }
 0xbeb   :  { %v3863_v14 = vand.u32 4294901760, %v3778_v61  ;;  %v3775_v0 = vsel %vm71_vm0, %v3764_v8, 0 }
 0xbec   :  { %v3853_v4 = vand.u32 4294901760, %v3775_v0 }
 0xbed   :  { %v3864_v59 = vsub.f32 %v3778_v61, %v3863_v14 }
 0xbee   :  { %v3854_v63 = vsub.f32 %v3775_v0, %v3853_v4 }
 0xbef   :  { %v3865_v27 = vand.u32 4294901760, %v3864_v59 }
 0xbf0   :  { %v3855_v34 = vand.u32 4294901760, %v3854_v63 }
 0xbf1   :  { %v3866_v26 = vsub.f32 %v3864_v59, %v3865_v27 }
 0xbf2   :  { %v3856_v56 = vsub.f32 %v3854_v63, %v3855_v34 }
 0xbf3   :  { %v3867_v28 = vand.u32 4294901760, %v3866_v26 }
 0xbf4   :  { %v3857_v1 = vand.u32 4294901760, %v3856_v56 }
 0xbf6   :  { %5893 = vmatprep.mubr.f32.mxu1 %v3857_v1 }
 0xbf7   :  { %5894 = vmatmul.mubr.f32.vlgmr.msra.gmra.mrb[4].mxu1 %v3867_v28 }
 0xbf8   :  { %6508 = vmatpush3.bf16.msra.mxu1 %v7478_v17  ;;  %5912 = vmatprep.mubr.f32.mxu1 %v3853_v4 }
 0xbf9   :  { %6510 = vmatprep.subr.bf16.mxu1 %v6509_v50 }
 0xbfc   :  { %6512 = vmatpush3.bf16.msra.mxu1 %v6509_v50 }
 0xbfd   :  { %6514 = vmatprep.subr.bf16.mxu1 %v6513_v11 }
 0xc00   :  { %6516 = vmatpush3.bf16.msra.mxu1 %v6513_v11  ;;  %v4402_v11 = vld [vmem:[%s7569_s7 + $0x10] sm:$0xff] }
 0xc01   :  { %6518 = vmatprep.subr.bf16.mxu1 %v6517_v3 }
 0xc04   :  { %6520 = vmatpush3.bf16.msra.mxu1 %v6517_v3  ;;  %v4403_v3 = vld [vmem:[%s7569_s7 + $0x18] sm:$0xff] }
 0xc05   :  { %6522 = vmatprep.subr.bf16.mxu1 %v6521_v32 }
 0xc07   :  { %5913 = vmatmul.mubr.f32.vlgmr.msra.gmra.mrb[4].mxu1 %v3863_v14 }
 0xc08   :  { %6524 = vmatpush3.bf16.msra.mxu1 %v6521_v32  ;;  %5931 = vmatprep.mubr.f32.mxu1 %v3854_v63  ;;  %v4417_v32 = vand.u32 4294901760, %v4402_v11  ;;  %v4396_v63 = vsub.s32 5, %v7013_v18 }
 0xc09   :  { %6526 = vmatprep.subr.bf16.mxu1 %v6525_v22 }
 0xc0a   :  { %v4515_v42 = vsub.f32 %v4402_v11, %v4417_v32  ;;  %v4397_v1 = vrot.slane %v7424_v45, %v4396_v63 }
 0xc0c   :  { %6528 = vmatpush3.bf16.msra.mxu1 %v6525_v22  ;;  %v4420_v22 = vand.u32 4294901760, %v4403_v3  ;;  %v4516_v43 = vand.u32 4294901760, %v4515_v42 }
 0xc0d   :  { %6530 = vmatprep.subr.bf16.mxu1 %v6529_v35 }
 0xc0e   :  { %v4522_v48 = vsub.f32 %v4403_v3, %v4420_v22  ;;  %v4517_v58 = vsub.f32 %v4515_v42, %v4516_v43 }
 0xc10   :  { %6532 = vmatpush3.bf16.msra.mxu1 %v6529_v35  ;;  %v4523_v2 = vand.u32 4294901760, %v4522_v48  ;;  %v4518_v53 = vand.u32 4294901760, %v4517_v58  ;;  %v6605_v19 = vpack.c.bf16 %v4522_v48, %v4515_v42 }
 0xc11   :  { %6534 = vmatprep.subr.bf16.mxu1 %v6533_v49 }
 0xc12   :  { %v4524_v16 = vsub.f32 %v4522_v48, %v4523_v2  ;;  %v6621_v7 = vpack.c.bf16 %v4523_v2, %v4516_v43 }
 0xc14   :  { %6536 = vmatpush3.bf16.msra.mxu1 %v6533_v49  ;;  %v7536_v49 = vpack.c.bf16 %v4420_v22, %v4417_v32  ;;  %v4525_v20 = vand.u32 4294901760, %v4524_v16 }
 0xc15   :  { %6538 = vmatprep.subr.bf16.mxu1 %v7444_v55 }
 0xc16   :  { %v6597_v12 = vpack.c.bf16 %v4525_v20, %v4518_v53 }
 0xc17   :  { %5932 = vmatmul.mubr.f32.vlgmr.msra.gmra.mrb[4].mxu1 %v3864_v59  ;;  %v4390_v59 = vsub.s32 4, %v7013_v18 }
 0xc18   :  { %6540 = vmatpush3.bf16.msra.mxu1 %v7444_v55  ;;  %5950 = vmatprep.mubr.f32.mxu1 %v3855_v34 }
 0xc19   :  { %6542 = vmatprep.subr.bf16.mxu1 %v7454_v40 }
 0xc1c   :  { %6544 = vmatpush3.bf16.msra.mxu1 %v7454_v40 }
 0xc1d   :  { %6546 = vmatprep.subr.bf16.mxu1 %v7470_v33 }
 0xc20   :  { %6548 = vmatpush3.bf16.msra.mxu1 %v7470_v33 }
 0xc21   :  { %6550 = vmatprep.subr.bf16.mxu1 %v7472_v60 }
 0xc24   :  { %6552 = vmatpush3.bf16.msra.mxu1 %v7472_v60 }
 0xc25   :  { %6554 = vmatprep.subr.bf16.mxu1 %v7481_v38 }
 0xc27   :  { %5951 = vmatmul.mubr.f32.vlgmr.msra.gmra.mrb[4].mxu1 %v3865_v27  ;;  %v4391_v27 = vrot.slane %v7424_v45, %v4390_v59 }
 0xc28   :  { %6556 = vmatpush3.bf16.msra.mxu1 %v7481_v38  ;;  %5969 = vmatprep.mubr.f32.mxu1 %v3853_v4 }
 0xc29   :  { %6558 = vmatprep.subr.bf16.mxu1 %v7483_v37 }
 0xc2c   :  { %6560 = vmatpush3.bf16.msra.mxu1 %v7483_v37  ;;  %v4508_v37 = vsub.f32 %v4401_v46, %v4414_v30 }
 0xc2d   :  { %6562 = vmatprep.subr.bf16.mxu1 %v7485_v39 }
 0xc30   :  { %6564 = vmatpush3.bf16.msra.mxu1 %v7485_v39 }
 0xc31   :  { %6566 = vmatprep.subr.bf16.mxu1 %v7487_v41 }
 0xc34   :  { %6568 = vmatpush3.bf16.msra.mxu1 %v7487_v41  ;;  %v4509_v41 = vand.u32 4294901760, %v4508_v37 }
 0xc35   :  { %6570 = vmatprep.subr.bf16.mxu1 %v7444_v55 }
 0xc36   :  { %v4510_v52 = vsub.f32 %v4508_v37, %v4509_v41 }
 0xc37   :  { %5970 = vmatmul.mubr.f32.vlgmr.msra.gmra.mrb[4].mxu1 %v3863_v14 }
 0xc38   :  { %6572 = vmatpush3.bf16.msra.mxu1 %v7444_v55  ;;  %5988 = vmatprep.mubr.f32.mxu1 %v3853_v4  ;;  %v4511_v15 = vand.u32 4294901760, %v4510_v52 }
 0xc39   :  { %6574 = vmatprep.subr.bf16.mxu1 %v7454_v40 }
 0xc3c   :  { %6576 = vmatpush3.bf16.msra.mxu1 %v7454_v40 }
 0xc3d   :  { %6578 = vmatprep.subr.bf16.mxu1 %v7470_v33 }
 0xc40   :  { %6580 = vmatpush3.bf16.msra.mxu1 %v7470_v33 }
 0xc41   :  { %6582 = vmatprep.subr.bf16.mxu1 %v7472_v60 }
 0xc44   :  { %6584 = vmatpush3.bf16.msra.mxu1 %v7472_v60 }
 0xc47   :  { %5989 = vmatmul.mubr.f32.vlgmr.msra.gmra.mrb[4].mxu1 %v3863_v14 }
 0xd1a   :  { %v5990_v17 = vpop.f32.mrb[4].mxu1 }
 0xd1b   :  { %v4361_v50 = vadd.f32 %v5990_v17, %v7389_v47  ;;  %v4350_v23 = vpop.f32.mrb[5].mxu1 }
 0xd1c   :  { %v4360_v55 = vadd.f32 %v4350_v23, %v7392_v9  ;;  %v4400_v9 = vld [vmem:[%s7569_s7] sm:$0xff] }
 0xd1d   :  { %v4365_v31 = vsel %vm659_vm3, %v4361_v50, 0.0  ;;  %v4411_v13 = vand.u32 4294901760, %v4400_v9 }
 0xd1e   :  { %4366 = vadd.xlane.f32.xlu0 %v4365_v31  ;;  %v4362_v40 = vsel %vm659_vm3, %v4360_v55, 0.0 }
 0xd1f   :  { %4363 = vadd.xlane.f32.xlu1 %v4362_v40  ;;  %v7534_v35 = vpack.c.bf16 %v4414_v30, %v4411_v13  ;;  %v4501_v38 = vsub.f32 %v4400_v9, %v4411_v13 }
 0xd21   :  { %6586 = vmatprep.subr.bf16.mxu0 %v7534_v35  ;;  %v4502_v39 = vand.u32 4294901760, %v4501_v38  ;;  %v6601_v57 = vpack.c.bf16 %v4508_v37, %v4501_v38 }
 0xd22   :  { %6588 = vmatpush3.bf16.msra.mxu0 %v7534_v35 }
 0xd23   :  { %6590 = vmatprep.subr.bf16.mxu0 %v7536_v49  ;;  %v4503_v36 = vsub.f32 %v4501_v38, %v4502_v39  ;;  %v6617_v10 = vpack.c.bf16 %v4509_v41, %v4502_v39 }
 0xd25   :  { %v4504_v44 = vand.u32 4294901760, %v4503_v36 }
 0xd26   :  { %6592 = vmatpush3.bf16.msra.mxu0 %v7536_v49 }
 0xd27   :  { %v6593_v24 = vpack.c.bf16 %v4511_v15, %v4504_v44 }
 0xd29   :  { %6594 = vmatprep.subr.bf16.mxu0 %v6593_v24 }
 0xdab   :  { %v4367_v5 = vpop.xlane.xlu0 %4366 }
 0xdac   :  { %v4369_v51 = vmul.f32 0.03125, %v4367_v5  ;;  %v4364_v33 = vpop.xlane.xlu1 %4363 }
 0xdad   :  { %v4368_v25 = vmul.f32 0.03125, %v4364_v33 }
 0xdae   :  { %v4371_v62 = vsub.f32 %v4361_v50, %v4369_v51 }
 0xdaf   :  { %v4370_v6 = vsub.f32 %v4360_v55, %v4368_v25 }
 0xdb0   :  { %v4373_v60 = vmul.f32 %v4371_v62, %v4371_v62 }
 0xdb1   :  { %v4372_v29 = vmul.f32 %v4370_v6, %v4370_v6 }
 0xdb2   :  { %v4377_v54 = vsel %vm659_vm3, %v4373_v60, 0.0 }
 0xdb3   :  { %4378 = vadd.xlane.f32.xlu0 %v4377_v54  ;;  %v4374_v47 = vsel %vm659_vm3, %v4372_v29, 0.0 }
 0xdb4   :  { %4375 = vadd.xlane.f32.xlu1 %v4374_v47 }
 0xe40   :  { %v4379_v21 = vpop.xlane.xlu0 %4378 }
 0xe41   :  { %v4381_v8 = vmul.f32 0.03125, %v4379_v21  ;;  %v4376_v61 = vpop.xlane.xlu1 %4375 }
 0xe42   :  { %v4380_v14 = vmul.f32 0.03125, %v4376_v61 }
 0xe43   :  { %v4383_v0 = vadd.f32 1e-05, %v4381_v8 }
 0xe44   :  { %v4382_v4 = vadd.f32 1e-05, %v4380_v14 }
 0xe45   :  { %6742 = vrsqrt.f32 %v4383_v0 }
 0xe46   :  { %6744 = vrsqrt.f32 %v4382_v4 }
 0xe4f   :  { %v6743_v34 = vpop.eup %6742 }
 0xe50   :  { %v6745_v26 = vpop.eup %6744  ;;  %v4387_v56 = vmul.f32 %v6743_v34, %v4371_v62 }
 0xe51   :  { %v4386_v28 = vmul.f32 %v6745_v26, %v4370_v6 }
 0xe52   :  { %v4393_v17 = vmul.f32 %v4391_v27, %v4387_v56 }
 0xe53   :  { %v4392_v50 = vmul.f32 %v4391_v27, %v4386_v28 }
 0xe54   :  { %v4399_v23 = vadd.f32 %v4397_v1, %v4393_v17 }
 0xe55   :  { %v4398_v55 = vadd.f32 %v4397_v1, %v4392_v50 }
 0xe56   :  { %v4408_v31 = vsel %vm659_vm3, %v4399_v23, 0 }
 0xe57   :  { %v4405_v40 = vsel %vm659_vm3, %v4398_v55, 0  ;;  %v4489_v5 = vand.u32 4294901760, %v4408_v31 }
 0xe58   :  { %v4479_v51 = vand.u32 4294901760, %v4405_v40 }
 0xe59   :  { %v4490_v33 = vsub.f32 %v4408_v31, %v4489_v5 }
 0xe5a   :  { %v4480_v18 = vsub.f32 %v4405_v40, %v4479_v51 }
 0xe5b   :  { %v4491_v25 = vand.u32 4294901760, %v4490_v33 }
 0xe5c   :  { %v4481_v60 = vand.u32 4294901760, %v4480_v18 }
 0xe5d   :  { %v4492_v29 = vsub.f32 %v4490_v33, %v4491_v25 }
 0xe5e   :  { %v4482_v54 = vsub.f32 %v4480_v18, %v4481_v60 }
 0xe5f   :  { %v4493_v47 = vand.u32 4294901760, %v4492_v29 }
 0xe60   :  { %v4483_v62 = vand.u32 4294901760, %v4482_v54 }
 0xe62   :  { %5999 = vmatprep.mubr.f32.mxu0 %v4483_v62 }
 0xe63   :  { %6000 = vmatmul.mubr.f32.vlgmr.msra.gmra.mrb[8].mxu0 %v4493_v47 }
 0xe64   :  { %6596 = vmatpush3.bf16.msra.mxu0 %v6593_v24  ;;  %6010 = vmatprep.mubr.f32.mxu0 %v4479_v51 }
 0xe65   :  { %6598 = vmatprep.subr.bf16.mxu0 %v6597_v12 }
 0xe68   :  { %6600 = vmatpush3.bf16.msra.mxu0 %v6597_v12 }
 0xe69   :  { %6602 = vmatprep.subr.bf16.mxu0 %v6601_v57 }
 0xe6b   :  { %6011 = vmatmul.mubr.f32.vlgmr.msra.gmra.mrb[8].mxu0 %v4489_v5 }
 0xe6c   :  { %6604 = vmatpush3.bf16.msra.mxu0 %v6601_v57  ;;  %6021 = vmatprep.mubr.f32.mxu0 %v4480_v18 }
 0xe6d   :  { %6606 = vmatprep.subr.bf16.mxu0 %v6605_v19 }
 0xe70   :  { %6608 = vmatpush3.bf16.msra.mxu0 %v6605_v19 }
 0xe71   :  { %6610 = vmatprep.subr.bf16.mxu0 %v7534_v35 }
 0xe73   :  { %6022 = vmatmul.mubr.f32.vlgmr.msra.gmra.mrb[8].mxu0 %v4490_v33 }
 0xe74   :  { %6612 = vmatpush3.bf16.msra.mxu0 %v7534_v35  ;;  %6032 = vmatprep.mubr.f32.mxu0 %v4481_v60 }
 0xe75   :  { %6614 = vmatprep.subr.bf16.mxu0 %v7536_v49 }
 0xe78   :  { %6616 = vmatpush3.bf16.msra.mxu0 %v7536_v49 }
 0xe79   :  { %6618 = vmatprep.subr.bf16.mxu0 %v6617_v10 }
 0xe7b   :  { %6033 = vmatmul.mubr.f32.vlgmr.msra.gmra.mrb[8].mxu0 %v4491_v25 }
 0xe7c   :  { %6620 = vmatpush3.bf16.msra.mxu0 %v6617_v10  ;;  %6043 = vmatprep.mubr.f32.mxu0 %v4479_v51 }
 0xe7d   :  { %6622 = vmatprep.subr.bf16.mxu0 %v6621_v7 }
 0xe80   :  { %6624 = vmatpush3.bf16.msra.mxu0 %v6621_v7 }
 0xe81   :  { %6626 = vmatprep.subr.bf16.mxu0 %v7534_v35 }
 0xe83   :  { %6044 = vmatmul.mubr.f32.vlgmr.msra.gmra.mrb[8].mxu0 %v4489_v5 }
 0xe84   :  { %6628 = vmatpush3.bf16.msra.mxu0 %v7534_v35  ;;  %6054 = vmatprep.mubr.f32.mxu0 %v4479_v51 }
 0xe85   :  { %6630 = vmatprep.subr.bf16.mxu0 %v7536_v49 }
 0xe88   :  { %6632 = vmatpush3.bf16.msra.mxu0 %v7536_v49 }
 0xe8b   :  { %6055 = vmatmul.mubr.f32.vlgmr.msra.gmra.mrb[8].mxu0 %v4489_v5 }
 0xf5e   :  { %v6056_v45 = vpop.f32.mrb[8].mxu0 }
 0xf5f   :  { %4939 = vst [vmem:[%s7572_s10 + $0x8] sm:$0xff] %v6056_v45  ;;  %v4928_v6 = vpop.f32.mrb[9].mxu0 }
 0xf60   :  { %4938 = vst [vmem:[%s7572_s10] sm:$0xff] %v4928_v6 }
 0xf61   :  { %4944 = vsyncpa [#allocation3], 1 }

</bundles_post_ra>
